<compile_context>
chip_gen: v7x
topology: tpu7x:2x2x1
jax: 0.10.0
libtpu: 0.0.40
codegen_flags: <defaults>
</compile_context>

<pallas_src>
import jax
import jax.numpy as jnp
from jax import lax
from jax.experimental import pallas as pl
from jax.experimental.pallas import tpu as pltpu

# ----------------------------- config ---------------------------------------
B = 2          # batch
C = 4          # input channels
IMG = 16       # image size
P = 8          # patch size
N_PATCH = (IMG // P) ** 2          # 4 patches
S = N_PATCH + 1                    # sequence length (CLS + patches) = 5
BS = B * S                         # folded batch*seq rows = 10
H = 32         # hidden size
NH = 4         # attention heads
HD = H // NH   # head dim = 8
M = 64         # MLP intermediate size
L = 2          # num labels
NLAYERS = 2
EPS = 1e-12    # HF ViT layer_norm_eps
DP = C * P * P                     # flattened patch dim = 256
OUT_W = 128    # lane-dense output width: lanes [0,L) logits, lane L = loss
NEG = -1e30


# ----------------------------- helpers (traced inside the kernel) ------------
def _layernorm(x, g, b):
    mu = jnp.mean(x, axis=-1, keepdims=True)
    var = jnp.mean((x - mu) ** 2, axis=-1, keepdims=True)
    return (x - mu) * lax.rsqrt(var + EPS) * g + b


def _gelu(x):
    # TODO(synk): HF ViT uses exact (erf) GELU; tanh approximation used here.
    c = 0.7978845608028654  # sqrt(2/pi)
    return 0.5 * x * (1.0 + jnp.tanh(c * (x + 0.044715 * x * x * x)))


# ----------------------------- the fused kernel ------------------------------
def vit_kernel(patches_ref, wpatch_ref, embadd_ref, labels_ref,
               wqkv_ref, bqkv_ref, wo_ref, vecs_ref, w1_ref, b1_ref, w2_ref,
               lnf_ref, wc_ref, bc_ref, out_ref):
    # ---- patch embedding: zero rows at CLS slots, additive term carries cls/bias/pos.
    x = jnp.dot(patches_ref[...], wpatch_ref[...],
                preferred_element_type=jnp.float32) + embadd_ref[...]      # (BS, H)

    # ---- static masks (built from iota; shared by all layers/heads)
    lane_h = lax.broadcasted_iota(jnp.int32, (1, H), 1)                    # (1, H)
    ri = lax.broadcasted_iota(jnp.int32, (BS, BS), 0)
    ci = lax.broadcasted_iota(jnp.int32, (BS, BS), 1)
    same = jnp.zeros((BS, BS), jnp.bool_)
    for b in range(B):                                                     # block-diagonal
        rin = (ri >= b * S) & (ri < (b + 1) * S)
        cin = (ci >= b * S) & (ci < (b + 1) * S)
        same = same | (rin & cin)
    attn_bias = jnp.where(same, 0.0, NEG)                                  # (BS, BS)

    scale = 1.0 / (HD ** 0.5)

    # ---- transformer layers (unrolled; weights indexed statically by layer)
    for l in range(NLAYERS):
        wqkv = wqkv_ref[l]          # (H, 3H)
        bqkv = bqkv_ref[l]          # (1, 3H)
        wo = wo_ref[l]              # (H, H)
        vecs = vecs_ref[l]          # (6, H): [ln1g, ln1b, ln2g, ln2b, bo, b2]
        w1 = w1_ref[l]              # (H, M)
        b1 = b1_ref[l]              # (1, M)
        w2 = w2_ref[l]              # (M, H)

        ln1g, ln1b = vecs[0:1, :], vecs[1:2, :]
        ln2g, ln2b = vecs[2:3, :], vecs[3:4, :]
        bo, b2 = vecs[4:5, :], vecs[5:6, :]

        h = _layernorm(x, ln1g, ln1b)
        qkv = jnp.dot(h, wqkv, preferred_element_type=jnp.float32) + bqkv  # (BS, 3H)
        q = qkv[:, 0:H]
        k = qkv[:, H:2 * H]
        v = qkv[:, 2 * H:3 * H]

        # per-head attention via lane masks: no HD-sized slices, no concatenate.
        ctx = jnp.zeros((BS, H), jnp.float32)
        for hh in range(NH):
            hm = ((lane_h >= hh * HD) & (lane_h < (hh + 1) * HD)).astype(jnp.float32)
            s = jnp.dot(q * hm, k.T, preferred_element_type=jnp.float32) * scale
            s = s + attn_bias
            m = jnp.max(s, axis=-1, keepdims=True)
            p = jnp.exp(s - m)
            p = p * pl.reciprocal(jnp.sum(p, axis=-1, keepdims=True), approx=True)
            ctx = ctx + jnp.dot(p, v, preferred_element_type=jnp.float32) * hm

        attn_out = jnp.dot(ctx, wo, preferred_element_type=jnp.float32) + bo
        x = x + attn_out

        h2 = _layernorm(x, ln2g, ln2b)
        mid = _gelu(jnp.dot(h2, w1, preferred_element_type=jnp.float32) + b1)
        x = x + jnp.dot(mid, w2, preferred_element_type=jnp.float32) + b2

    # ---- head: pick the CLS rows with a tiny selection matmul (no sublane gather)
    rsel = lax.broadcasted_iota(jnp.int32, (B, BS), 0)
    csel = lax.broadcasted_iota(jnp.int32, (B, BS), 1)
    sel = (csel == rsel * S).astype(jnp.float32)                           # (B, BS)
    cls = jnp.dot(sel, x, preferred_element_type=jnp.float32)              # (B, H)
    cls = _layernorm(cls, lnf_ref[0:1, :], lnf_ref[1:2, :])

    logits_full = jnp.dot(cls, wc_ref[...],
                          preferred_element_type=jnp.float32) + bc_ref[...]  # (B, OUT_W)

    lane = lax.broadcasted_iota(jnp.int32, (B, OUT_W), 1)
    masked = jnp.where(lane < L, logits_full, NEG)
    mmax = jnp.max(masked, axis=-1, keepdims=True)
    lse = mmax + jnp.log(jnp.sum(jnp.exp(masked - mmax), axis=-1, keepdims=True))
    labels = labels_ref[...]                                               # (B, 1) int32
    picked = jnp.sum(jnp.where(lane == labels, logits_full, 0.0),
                     axis=-1, keepdims=True)                               # (B, 1)
    loss = lse - picked                                                    # (B, 1)

    # lane-dense single output: logits in lanes [0, L), per-example loss in lane L.
    out_ref[...] = jnp.where(lane < L, logits_full,
                             jnp.where(lane == L, loss, 0.0))


# ----------------------------- wrapper ----------------------------------------
def _fullspec(shape):
    n = len(shape)
    return pl.BlockSpec(shape, lambda i: (0,) * n)


def extract_patches_folded(pixel_values):
    # NCHW -> (B, N_PATCH, C*P*P), patch flattened in (C, ph, pw) order to match a
    # flattened PyTorch Conv2d(stride=P) weight; then insert a zero row at each CLS
    # slot and fold batch into rows -> (B*S, DP).
    x = pixel_values.reshape(B, C, IMG // P, P, IMG // P, P)
    x = x.transpose(0, 2, 4, 1, 3, 5).reshape(B, N_PATCH, DP)
    x = jnp.pad(x, ((0, 0), (1, 0), (0, 0)))           # zero CLS row per batch element
    return x.reshape(BS, DP)


def pack_params(params):
    # Parameter-only packing/layout prep (tiny, fused by XLA).
    w_patch = params["conv_w"].reshape(H, DP).T                            # (DP, H)
    row_cls = params["cls"] + params["pos"][0:1]                           # (1, H)
    rows_p = params["conv_b"] + params["pos"][1:]                          # (N_PATCH, H)
    emb_add = jnp.tile(jnp.concatenate([row_cls, rows_p], axis=0), (B, 1))  # (BS, H)

    layers = params["layers"]
    wqkv = jnp.stack([jnp.concatenate([lw["wq"], lw["wk"], lw["wv"]], axis=1)
                      for lw in layers])                                   # (NL, H, 3H)
    bqkv = jnp.stack([jnp.concatenate([lw["bq"], lw["bk"], lw["bv"]], axis=1)
                      for lw in layers])                                   # (NL, 1, 3H)
    wo = jnp.stack([lw["wo"] for lw in layers])                            # (NL, H, H)
    vecs = jnp.stack([jnp.concatenate([lw["ln1g"], lw["ln1b"], lw["ln2g"],
                                       lw["ln2b"], lw["bo"], lw["b2"]], axis=0)
                      for lw in layers])                                   # (NL, 6, H)
    w1 = jnp.stack([lw["w1"] for lw in layers])                            # (NL, H, M)
    b1 = jnp.stack([lw["b1"] for lw in layers])                            # (NL, 1, M)
    w2 = jnp.stack([lw["w2"] for lw in layers])                            # (NL, M, H)

    lnf = jnp.concatenate([params["ln_f_g"], params["ln_f_b"]], axis=0)    # (2, H)
    wc = jnp.zeros((H, OUT_W), jnp.float32).at[:, :L].set(params["clf_w"])
    bc = jnp.zeros((1, OUT_W), jnp.float32).at[:, :L].set(params["clf_b"])
    return dict(w_patch=w_patch, emb_add=emb_add, wqkv=wqkv, bqkv=bqkv, wo=wo,
                vecs=vecs, w1=w1, b1=b1, w2=w2, lnf=lnf, wc=wc, bc=bc)


@jax.jit
def vit_classification_forward(pixel_values, labels, params):
    packed = pack_params(params)
    patches = extract_patches_folded(pixel_values)
    labels2d = labels.astype(jnp.int32).reshape(B, 1)

    out = pl.pallas_call(
        vit_kernel,
        out_shape=jax.ShapeDtypeStruct((B, OUT_W), jnp.float32),
        grid_spec=pltpu.PrefetchScalarGridSpec(
            num_scalar_prefetch=0,
            grid=(1,),
            in_specs=[
                _fullspec((BS, DP)),             # patches (zero rows at CLS slots)
                _fullspec((DP, H)),              # patch embedding weight
                _fullspec((BS, H)),              # cls/conv-bias/pos additive term
                _fullspec((B, 1)),               # labels
                _fullspec((NLAYERS, H, 3 * H)),  # Wqkv
                _fullspec((NLAYERS, 1, 3 * H)),  # bqkv
                _fullspec((NLAYERS, H, H)),      # Wo
                _fullspec((NLAYERS, 6, H)),      # [ln1g, ln1b, ln2g, ln2b, bo, b2]
                _fullspec((NLAYERS, H, M)),      # W1
                _fullspec((NLAYERS, 1, M)),      # b1
                _fullspec((NLAYERS, M, H)),      # W2
                _fullspec((2, H)),               # final LN gamma/beta
                _fullspec((H, OUT_W)),           # classifier W (lane-padded)
                _fullspec((1, OUT_W)),           # classifier b (lane-padded)
            ],
            out_specs=_fullspec((B, OUT_W)),
        ),
        compiler_params=pltpu.CompilerParams(dimension_semantics=("arbitrary",)),
    )(patches, packed["w_patch"], packed["emb_add"], labels2d,
      packed["wqkv"], packed["bqkv"], packed["wo"], packed["vecs"],
      packed["w1"], packed["b1"], packed["w2"],
      packed["lnf"], packed["wc"], packed["bc"])

    logits = out[:, :L]
    loss = jnp.mean(out[:, L])                       # CrossEntropyLoss(mean)
    return loss, logits


# ----------------------------- parameters --------------------------------------
def init_params(key):
    std = 0.02
    ks = iter(jax.random.split(key, 8 + NLAYERS * 12))
    p = {
        # conv patch embedding: PyTorch layout (out=H, in=C, kh=P, kw=P)
        "conv_w": jax.random.normal(next(ks), (H, C, P, P), jnp.float32) * std,
        "conv_b": jax.random.normal(next(ks), (1, H), jnp.float32) * std,
        "cls": jax.random.normal(next(ks), (1, H), jnp.float32) * std,
        "pos": jax.random.normal(next(ks), (S, H), jnp.float32) * std,
        "ln_f_g": jnp.ones((1, H), jnp.float32),
        "ln_f_b": jnp.zeros((1, H), jnp.float32),
        "clf_w": jax.random.normal(next(ks), (H, L), jnp.float32) * std,
        "clf_b": jnp.zeros((1, L), jnp.float32),
        "layers": [],
    }
    for _ in range(NLAYERS):
        lw = {
            "ln1g": jnp.ones((1, H), jnp.float32), "ln1b": jnp.zeros((1, H), jnp.float32),
            "wq": jax.random.normal(next(ks), (H, H), jnp.float32) * std,
            "bq": jnp.zeros((1, H), jnp.float32),
            "wk": jax.random.normal(next(ks), (H, H), jnp.float32) * std,
            "bk": jnp.zeros((1, H), jnp.float32),
            "wv": jax.random.normal(next(ks), (H, H), jnp.float32) * std,
            "bv": jnp.zeros((1, H), jnp.float32),
            "wo": jax.random.normal(next(ks), (H, H), jnp.float32) * std,
            "bo": jnp.zeros((1, H), jnp.float32),
            "ln2g": jnp.ones((1, H), jnp.float32), "ln2b": jnp.zeros((1, H), jnp.float32),
            "w1": jax.random.normal(next(ks), (H, M), jnp.float32) * std,
            "b1": jnp.zeros((1, M), jnp.float32),
            "w2": jax.random.normal(next(ks), (M, H), jnp.float32) * std,
            "b2": jnp.zeros((1, H), jnp.float32),
        }
        p["layers"].append(lw)
    return p


# ----------------------------- main -------------------------------------------
if __name__ == "__main__":
    key = jax.random.PRNGKey(0)
    k_param, k_pix, k_lbl = jax.random.split(key, 3)
    params = init_params(k_param)
    pixel_values = jax.random.normal(k_pix, (B, C, IMG, IMG), jnp.float32)
    labels = jax.random.randint(k_lbl, (B,), 0, L, jnp.int32)

    loss, logits = vit_classification_forward(pixel_values, labels, params)
    jax.block_until_ready((loss, logits))
    assert logits.shape == (B, L) and loss.shape == ()
    assert bool(jnp.isfinite(loss)) and bool(jnp.all(jnp.isfinite(logits)))
    print("KERNEL_OK")
</pallas_src>

<mosaic_0001>
module attributes {stable_mosaic.version = 11 : i64} {
  func.func @vit_kernel(%arg0: i32, %arg1: memref<10x256xf32, #tpu.memory_space<vmem>>, %arg2: memref<256x32xf32, #tpu.memory_space<vmem>>, %arg3: memref<10x32xf32, #tpu.memory_space<vmem>>, %arg4: memref<2x1xi32, #tpu.memory_space<vmem>>, %arg5: memref<2x32x96xf32, #tpu.memory_space<vmem>>, %arg6: memref<2x1x96xf32, #tpu.memory_space<vmem>>, %arg7: memref<2x32x32xf32, #tpu.memory_space<vmem>>, %arg8: memref<2x6x32xf32, #tpu.memory_space<vmem>>, %arg9: memref<2x32x64xf32, #tpu.memory_space<vmem>>, %arg10: memref<2x1x64xf32, #tpu.memory_space<vmem>>, %arg11: memref<2x64x32xf32, #tpu.memory_space<vmem>>, %arg12: memref<2x32xf32, #tpu.memory_space<vmem>>, %arg13: memref<32x128xf32, #tpu.memory_space<vmem>>, %arg14: memref<1x128xf32, #tpu.memory_space<vmem>>, %arg15: memref<2x128xf32, #tpu.memory_space<vmem>>) attributes {dimension_semantics = [#tpu.dimension_semantics<arbitrary>], iteration_bounds = array<i64: 1>, scalar_prefetch = 0 : i64, scratch_operands = 0 : i64, tpu.core_type = #tpu.core_type<tc>, window_params = [{pipeline_mode = #tpu.pipeline_mode<synchronous>, transform_indices = @transform_0, window_bounds = array<i64: 10, 256>}, {pipeline_mode = #tpu.pipeline_mode<synchronous>, transform_indices = @transform_1, window_bounds = array<i64: 256, 32>}, {pipeline_mode = #tpu.pipeline_mode<synchronous>, transform_indices = @transform_2, window_bounds = array<i64: 10, 32>}, {pipeline_mode = #tpu.pipeline_mode<synchronous>, transform_indices = @transform_3, window_bounds = array<i64: 2, 1>}, {pipeline_mode = #tpu.pipeline_mode<synchronous>, transform_indices = @transform_4, window_bounds = array<i64: 2, 32, 96>}, {pipeline_mode = #tpu.pipeline_mode<synchronous>, transform_indices = @transform_5, window_bounds = array<i64: 2, 1, 96>}, {pipeline_mode = #tpu.pipeline_mode<synchronous>, transform_indices = @transform_6, window_bounds = array<i64: 2, 32, 32>}, {pipeline_mode = #tpu.pipeline_mode<synchronous>, transform_indices = @transform_7, window_bounds = array<i64: 2, 6, 32>}, {pipeline_mode = #tpu.pipeline_mode<synchronous>, transform_indices = @transform_8, window_bounds = array<i64: 2, 32, 64>}, {pipeline_mode = #tpu.pipeline_mode<synchronous>, transform_indices = @transform_9, window_bounds = array<i64: 2, 1, 64>}, {pipeline_mode = #tpu.pipeline_mode<synchronous>, transform_indices = @transform_10, window_bounds = array<i64: 2, 64, 32>}, {pipeline_mode = #tpu.pipeline_mode<synchronous>, transform_indices = @transform_11, window_bounds = array<i64: 2, 32>}, {pipeline_mode = #tpu.pipeline_mode<synchronous>, transform_indices = @transform_12, window_bounds = array<i64: 32, 128>}, {pipeline_mode = #tpu.pipeline_mode<synchronous>, transform_indices = @transform_13, window_bounds = array<i64: 1, 128>}, {pipeline_mode = #tpu.pipeline_mode<synchronous>, transform_indices = @transform_14, window_bounds = array<i64: 2, 128>}]} {
    %c0 = arith.constant 0 : index
    %c0_0 = arith.constant 0 : index
    %0 = vector.load %arg1[%c0, %c0_0] : memref<10x256xf32, #tpu.memory_space<vmem>>, vector<10x256xf32>
    %c0_1 = arith.constant 0 : index
    %c0_2 = arith.constant 0 : index
    %1 = vector.load %arg2[%c0_1, %c0_2] : memref<256x32xf32, #tpu.memory_space<vmem>>, vector<256x32xf32>
    %cst = arith.constant dense<0.000000e+00> : vector<10x32xf32>
    %2 = tpu.matmul %0, %1, %cst {dimension_numbers = #tpu.dot_dimension_numbers<[1], [0], [0], [1], [0, 0, 1, 1], [], []>} : vector<10x256xf32>, vector<256x32xf32>, vector<10x32xf32> -> vector<10x32xf32>
    %c0_3 = arith.constant 0 : index
    %c0_4 = arith.constant 0 : index
    %3 = vector.load %arg3[%c0_3, %c0_4] : memref<10x32xf32, #tpu.memory_space<vmem>>, vector<10x32xf32>
    %4 = arith.addf %2, %3 : vector<10x32xf32>
    %5 = tpu.iota {dimensions = array<i32: 1>} : vector<1x32xi32>
    %6 = tpu.iota {dimensions = array<i32: 0>} : vector<10x10xi32>
    %7 = tpu.iota {dimensions = array<i32: 1>} : vector<10x10xi32>
    %false = arith.constant false
    %8 = vector.broadcast %false : i1 to vector<10x10xi1>
    %c0_i32 = arith.constant 0 : i32
    %9 = vector.broadcast %c0_i32 : i32 to vector<10x10xi32>
    %10 = arith.cmpi sge, %6, %9 : vector<10x10xi32>
    %c5_i32 = arith.constant 5 : i32
    %11 = vector.broadcast %c5_i32 : i32 to vector<10x10xi32>
    %12 = arith.cmpi slt, %6, %11 : vector<10x10xi32>
    %13 = arith.andi %10, %12 : vector<10x10xi1>
    %c0_i32_5 = arith.constant 0 : i32
    %14 = vector.broadcast %c0_i32_5 : i32 to vector<10x10xi32>
    %15 = arith.cmpi sge, %7, %14 : vector<10x10xi32>
    %c5_i32_6 = arith.constant 5 : i32
    %16 = vector.broadcast %c5_i32_6 : i32 to vector<10x10xi32>
    %17 = arith.cmpi slt, %7, %16 : vector<10x10xi32>
    %18 = arith.andi %15, %17 : vector<10x10xi1>
    %19 = arith.andi %13, %18 : vector<10x10xi1>
    %20 = arith.ori %8, %19 : vector<10x10xi1>
    %c5_i32_7 = arith.constant 5 : i32
    %21 = vector.broadcast %c5_i32_7 : i32 to vector<10x10xi32>
    %22 = arith.cmpi sge, %6, %21 : vector<10x10xi32>
    %c10_i32 = arith.constant 10 : i32
    %23 = vector.broadcast %c10_i32 : i32 to vector<10x10xi32>
    %24 = arith.cmpi slt, %6, %23 : vector<10x10xi32>
    %25 = arith.andi %22, %24 : vector<10x10xi1>
    %c5_i32_8 = arith.constant 5 : i32
    %26 = vector.broadcast %c5_i32_8 : i32 to vector<10x10xi32>
    %27 = arith.cmpi sge, %7, %26 : vector<10x10xi32>
    %c10_i32_9 = arith.constant 10 : i32
    %28 = vector.broadcast %c10_i32_9 : i32 to vector<10x10xi32>
    %29 = arith.cmpi slt, %7, %28 : vector<10x10xi32>
    %30 = arith.andi %27, %29 : vector<10x10xi1>
    %31 = arith.andi %25, %30 : vector<10x10xi1>
    %32 = arith.ori %20, %31 : vector<10x10xi1>
    %cst_10 = arith.constant 0.000000e+00 : f32
    %cst_11 = arith.constant -1.000000e+30 : f32
    %33 = vector.broadcast %cst_10 : f32 to vector<10x10xf32>
    %34 = vector.broadcast %cst_11 : f32 to vector<10x10xf32>
    %35 = arith.select %32, %33, %34 : vector<10x10xi1>, vector<10x10xf32>
    %c0_12 = arith.constant 0 : index
    %c0_13 = arith.constant 0 : index
    %c0_14 = arith.constant 0 : index
    %36 = vector.load %arg5[%c0_12, %c0_13, %c0_14] : memref<2x32x96xf32, #tpu.memory_space<vmem>>, vector<1x32x96xf32>
    %37 = vector.shape_cast %36 : vector<1x32x96xf32> to vector<32x96xf32>
    %c0_15 = arith.constant 0 : index
    %c0_16 = arith.constant 0 : index
    %c0_17 = arith.constant 0 : index
    %38 = vector.load %arg6[%c0_15, %c0_16, %c0_17] : memref<2x1x96xf32, #tpu.memory_space<vmem>>, vector<1x1x96xf32>
    %39 = vector.shape_cast %38 : vector<1x1x96xf32> to vector<1x96xf32>
    %c0_18 = arith.constant 0 : index
    %c0_19 = arith.constant 0 : index
    %c0_20 = arith.constant 0 : index
    %40 = vector.load %arg7[%c0_18, %c0_19, %c0_20] : memref<2x32x32xf32, #tpu.memory_space<vmem>>, vector<1x32x32xf32>
    %41 = vector.shape_cast %40 : vector<1x32x32xf32> to vector<32x32xf32>
    %c0_21 = arith.constant 0 : index
    %c0_22 = arith.constant 0 : index
    %c0_23 = arith.constant 0 : index
    %42 = vector.load %arg8[%c0_21, %c0_22, %c0_23] : memref<2x6x32xf32, #tpu.memory_space<vmem>>, vector<1x6x32xf32>
    %43 = vector.shape_cast %42 : vector<1x6x32xf32> to vector<6x32xf32>
    %c0_24 = arith.constant 0 : index
    %c0_25 = arith.constant 0 : index
    %c0_26 = arith.constant 0 : index
    %44 = vector.load %arg9[%c0_24, %c0_25, %c0_26] : memref<2x32x64xf32, #tpu.memory_space<vmem>>, vector<1x32x64xf32>
    %45 = vector.shape_cast %44 : vector<1x32x64xf32> to vector<32x64xf32>
    %c0_27 = arith.constant 0 : index
    %c0_28 = arith.constant 0 : index
    %c0_29 = arith.constant 0 : index
    %46 = vector.load %arg10[%c0_27, %c0_28, %c0_29] : memref<2x1x64xf32, #tpu.memory_space<vmem>>, vector<1x1x64xf32>
    %47 = vector.shape_cast %46 : vector<1x1x64xf32> to vector<1x64xf32>
    %c0_30 = arith.constant 0 : index
    %c0_31 = arith.constant 0 : index
    %c0_32 = arith.constant 0 : index
    %48 = vector.load %arg11[%c0_30, %c0_31, %c0_32] : memref<2x64x32xf32, #tpu.memory_space<vmem>>, vector<1x64x32xf32>
    %49 = vector.shape_cast %48 : vector<1x64x32xf32> to vector<64x32xf32>
    %50 = vector.extract_strided_slice %43 {offsets = [0, 0], sizes = [1, 32], strides = [1, 1]} : vector<6x32xf32> to vector<1x32xf32>
    %51 = vector.extract_strided_slice %43 {offsets = [1, 0], sizes = [1, 32], strides = [1, 1]} : vector<6x32xf32> to vector<1x32xf32>
    %52 = vector.extract_strided_slice %43 {offsets = [2, 0], sizes = [1, 32], strides = [1, 1]} : vector<6x32xf32> to vector<1x32xf32>
    %53 = vector.extract_strided_slice %43 {offsets = [3, 0], sizes = [1, 32], strides = [1, 1]} : vector<6x32xf32> to vector<1x32xf32>
    %54 = vector.extract_strided_slice %43 {offsets = [4, 0], sizes = [1, 32], strides = [1, 1]} : vector<6x32xf32> to vector<1x32xf32>
    %55 = vector.extract_strided_slice %43 {offsets = [5, 0], sizes = [1, 32], strides = [1, 1]} : vector<6x32xf32> to vector<1x32xf32>
    %cst_33 = arith.constant dense<0.000000e+00> : vector<10xf32>
    %56 = vector.multi_reduction <add>, %4, %cst_33 [1] : vector<10x32xf32> to vector<10xf32>
    %57 = vector.shape_cast %56 : vector<10xf32> to vector<10x1xf32>
    %cst_34 = arith.constant 3.200000e+01 : f32
    %58 = vector.broadcast %cst_34 : f32 to vector<10x1xf32>
    %59 = arith.divf %57, %58 : vector<10x1xf32>
    %60 = vector.broadcast %59 : vector<10x1xf32> to vector<10x32xf32>
    %61 = arith.subf %4, %60 : vector<10x32xf32>
    %62 = arith.mulf %61, %61 : vector<10x32xf32>
    %cst_35 = arith.constant dense<0.000000e+00> : vector<10xf32>
    %63 = vector.multi_reduction <add>, %62, %cst_35 [1] : vector<10x32xf32> to vector<10xf32>
    %64 = vector.shape_cast %63 : vector<10xf32> to vector<10x1xf32>
    %cst_36 = arith.constant 3.200000e+01 : f32
    %65 = vector.broadcast %cst_36 : f32 to vector<10x1xf32>
    %66 = arith.divf %64, %65 : vector<10x1xf32>
    %67 = vector.broadcast %59 : vector<10x1xf32> to vector<10x32xf32>
    %68 = arith.subf %4, %67 : vector<10x32xf32>
    %cst_37 = arith.constant 9.99999996E-13 : f32
    %69 = vector.broadcast %cst_37 : f32 to vector<10x1xf32>
    %70 = arith.addf %66, %69 : vector<10x1xf32>
    %71 = math.rsqrt %70 : vector<10x1xf32>
    %72 = vector.broadcast %71 : vector<10x1xf32> to vector<10x32xf32>
    %73 = arith.mulf %68, %72 : vector<10x32xf32>
    %74 = vector.broadcast %50 : vector<1x32xf32> to vector<10x32xf32>
    %75 = arith.mulf %73, %74 : vector<10x32xf32>
    %76 = vector.broadcast %51 : vector<1x32xf32> to vector<10x32xf32>
    %77 = arith.addf %75, %76 : vector<10x32xf32>
    %cst_38 = arith.constant dense<0.000000e+00> : vector<10x96xf32>
    %78 = tpu.matmul %77, %37, %cst_38 {dimension_numbers = #tpu.dot_dimension_numbers<[1], [0], [0], [1], [0, 0, 1, 1], [], []>} : vector<10x32xf32>, vector<32x96xf32>, vector<10x96xf32> -> vector<10x96xf32>
    %79 = vector.broadcast %39 : vector<1x96xf32> to vector<10x96xf32>
    %80 = arith.addf %78, %79 : vector<10x96xf32>
    %81 = vector.extract_strided_slice %80 {offsets = [0, 0], sizes = [10, 32], strides = [1, 1]} : vector<10x96xf32> to vector<10x32xf32>
    %82 = vector.extract_strided_slice %80 {offsets = [0, 32], sizes = [10, 32], strides = [1, 1]} : vector<10x96xf32> to vector<10x32xf32>
    %83 = vector.extract_strided_slice %80 {offsets = [0, 64], sizes = [10, 32], strides = [1, 1]} : vector<10x96xf32> to vector<10x32xf32>
    %cst_39 = arith.constant 0.000000e+00 : f32
    %84 = vector.broadcast %cst_39 : f32 to vector<10x32xf32>
    %c0_i32_40 = arith.constant 0 : i32
    %85 = vector.broadcast %c0_i32_40 : i32 to vector<1x32xi32>
    %86 = arith.cmpi sge, %5, %85 : vector<1x32xi32>
    %c8_i32 = arith.constant 8 : i32
    %87 = vector.broadcast %c8_i32 : i32 to vector<1x32xi32>
    %88 = arith.cmpi slt, %5, %87 : vector<1x32xi32>
    %89 = arith.andi %86, %88 : vector<1x32xi1>
    %90 = arith.extui %89 : vector<1x32xi1> to vector<1x32xi32>
    %91 = arith.sitofp %90 : vector<1x32xi32> to vector<1x32xf32>
    %92 = vector.broadcast %91 : vector<1x32xf32> to vector<10x32xf32>
    %93 = arith.mulf %81, %92 : vector<10x32xf32>
    %94 = tpu.transpose %82, [1, 0] : vector<10x32xf32> -> vector<32x10xf32>
    %cst_41 = arith.constant dense<0.000000e+00> : vector<10x10xf32>
    %95 = tpu.matmul %93, %94, %cst_41 {dimension_numbers = #tpu.dot_dimension_numbers<[1], [0], [0], [1], [0, 0, 1, 1], [], []>} : vector<10x32xf32>, vector<32x10xf32>, vector<10x10xf32> -> vector<10x10xf32>
    %cst_42 = arith.constant 0.353553385 : f32
    %96 = vector.broadcast %cst_42 : f32 to vector<10x10xf32>
    %97 = arith.mulf %95, %96 : vector<10x10xf32>
    %98 = arith.addf %97, %35 : vector<10x10xf32>
    %cst_43 = arith.constant dense<0xFF800000> : vector<10xf32>
    %99 = vector.multi_reduction <maximumf>, %98, %cst_43 [1] : vector<10x10xf32> to vector<10xf32>
    %100 = vector.shape_cast %99 : vector<10xf32> to vector<10x1xf32>
    %101 = vector.broadcast %100 : vector<10x1xf32> to vector<10x10xf32>
    %102 = arith.subf %98, %101 : vector<10x10xf32>
    %103 = math.exp %102 : vector<10x10xf32>
    %cst_44 = arith.constant dense<0.000000e+00> : vector<10xf32>
    %104 = vector.multi_reduction <add>, %103, %cst_44 [1] : vector<10x10xf32> to vector<10xf32>
    %105 = vector.shape_cast %104 : vector<10xf32> to vector<10x1xf32>
    %106 = tpu.reciprocal %105 {approx = true} : vector<10x1xf32> -> vector<10x1xf32>
    %107 = vector.broadcast %106 : vector<10x1xf32> to vector<10x10xf32>
    %108 = arith.mulf %103, %107 : vector<10x10xf32>
    %cst_45 = arith.constant dense<0.000000e+00> : vector<10x32xf32>
    %109 = tpu.matmul %108, %83, %cst_45 {dimension_numbers = #tpu.dot_dimension_numbers<[1], [0], [0], [1], [0, 0, 1, 1], [], []>} : vector<10x10xf32>, vector<10x32xf32>, vector<10x32xf32> -> vector<10x32xf32>
    %110 = vector.broadcast %91 : vector<1x32xf32> to vector<10x32xf32>
    %111 = arith.mulf %109, %110 : vector<10x32xf32>
    %112 = arith.addf %84, %111 : vector<10x32xf32>
    %c8_i32_46 = arith.constant 8 : i32
    %113 = vector.broadcast %c8_i32_46 : i32 to vector<1x32xi32>
    %114 = arith.cmpi sge, %5, %113 : vector<1x32xi32>
    %c16_i32 = arith.constant 16 : i32
    %115 = vector.broadcast %c16_i32 : i32 to vector<1x32xi32>
    %116 = arith.cmpi slt, %5, %115 : vector<1x32xi32>
    %117 = arith.andi %114, %116 : vector<1x32xi1>
    %118 = arith.extui %117 : vector<1x32xi1> to vector<1x32xi32>
    %119 = arith.sitofp %118 : vector<1x32xi32> to vector<1x32xf32>
    %120 = vector.broadcast %119 : vector<1x32xf32> to vector<10x32xf32>
    %121 = arith.mulf %81, %120 : vector<10x32xf32>
    %122 = tpu.transpose %82, [1, 0] : vector<10x32xf32> -> vector<32x10xf32>
    %cst_47 = arith.constant dense<0.000000e+00> : vector<10x10xf32>
    %123 = tpu.matmul %121, %122, %cst_47 {dimension_numbers = #tpu.dot_dimension_numbers<[1], [0], [0], [1], [0, 0, 1, 1], [], []>} : vector<10x32xf32>, vector<32x10xf32>, vector<10x10xf32> -> vector<10x10xf32>
    %cst_48 = arith.constant 0.353553385 : f32
    %124 = vector.broadcast %cst_48 : f32 to vector<10x10xf32>
    %125 = arith.mulf %123, %124 : vector<10x10xf32>
    %126 = arith.addf %125, %35 : vector<10x10xf32>
    %cst_49 = arith.constant dense<0xFF800000> : vector<10xf32>
    %127 = vector.multi_reduction <maximumf>, %126, %cst_49 [1] : vector<10x10xf32> to vector<10xf32>
    %128 = vector.shape_cast %127 : vector<10xf32> to vector<10x1xf32>
    %129 = vector.broadcast %128 : vector<10x1xf32> to vector<10x10xf32>
    %130 = arith.subf %126, %129 : vector<10x10xf32>
    %131 = math.exp %130 : vector<10x10xf32>
    %cst_50 = arith.constant dense<0.000000e+00> : vector<10xf32>
    %132 = vector.multi_reduction <add>, %131, %cst_50 [1] : vector<10x10xf32> to vector<10xf32>
    %133 = vector.shape_cast %132 : vector<10xf32> to vector<10x1xf32>
    %134 = tpu.reciprocal %133 {approx = true} : vector<10x1xf32> -> vector<10x1xf32>
    %135 = vector.broadcast %134 : vector<10x1xf32> to vector<10x10xf32>
    %136 = arith.mulf %131, %135 : vector<10x10xf32>
    %cst_51 = arith.constant dense<0.000000e+00> : vector<10x32xf32>
    %137 = tpu.matmul %136, %83, %cst_51 {dimension_numbers = #tpu.dot_dimension_numbers<[1], [0], [0], [1], [0, 0, 1, 1], [], []>} : vector<10x10xf32>, vector<10x32xf32>, vector<10x32xf32> -> vector<10x32xf32>
    %138 = vector.broadcast %119 : vector<1x32xf32> to vector<10x32xf32>
    %139 = arith.mulf %137, %138 : vector<10x32xf32>
    %140 = arith.addf %112, %139 : vector<10x32xf32>
    %c16_i32_52 = arith.constant 16 : i32
    %141 = vector.broadcast %c16_i32_52 : i32 to vector<1x32xi32>
    %142 = arith.cmpi sge, %5, %141 : vector<1x32xi32>
    %c24_i32 = arith.constant 24 : i32
    %143 = vector.broadcast %c24_i32 : i32 to vector<1x32xi32>
    %144 = arith.cmpi slt, %5, %143 : vector<1x32xi32>
    %145 = arith.andi %142, %144 : vector<1x32xi1>
    %146 = arith.extui %145 : vector<1x32xi1> to vector<1x32xi32>
    %147 = arith.sitofp %146 : vector<1x32xi32> to vector<1x32xf32>
    %148 = vector.broadcast %147 : vector<1x32xf32> to vector<10x32xf32>
    %149 = arith.mulf %81, %148 : vector<10x32xf32>
    %150 = tpu.transpose %82, [1, 0] : vector<10x32xf32> -> vector<32x10xf32>
    %cst_53 = arith.constant dense<0.000000e+00> : vector<10x10xf32>
    %151 = tpu.matmul %149, %150, %cst_53 {dimension_numbers = #tpu.dot_dimension_numbers<[1], [0], [0], [1], [0, 0, 1, 1], [], []>} : vector<10x32xf32>, vector<32x10xf32>, vector<10x10xf32> -> vector<10x10xf32>
    %cst_54 = arith.constant 0.353553385 : f32
    %152 = vector.broadcast %cst_54 : f32 to vector<10x10xf32>
    %153 = arith.mulf %151, %152 : vector<10x10xf32>
    %154 = arith.addf %153, %35 : vector<10x10xf32>
    %cst_55 = arith.constant dense<0xFF800000> : vector<10xf32>
    %155 = vector.multi_reduction <maximumf>, %154, %cst_55 [1] : vector<10x10xf32> to vector<10xf32>
    %156 = vector.shape_cast %155 : vector<10xf32> to vector<10x1xf32>
    %157 = vector.broadcast %156 : vector<10x1xf32> to vector<10x10xf32>
    %158 = arith.subf %154, %157 : vector<10x10xf32>
    %159 = math.exp %158 : vector<10x10xf32>
    %cst_56 = arith.constant dense<0.000000e+00> : vector<10xf32>
    %160 = vector.multi_reduction <add>, %159, %cst_56 [1] : vector<10x10xf32> to vector<10xf32>
    %161 = vector.shape_cast %160 : vector<10xf32> to vector<10x1xf32>
    %162 = tpu.reciprocal %161 {approx = true} : vector<10x1xf32> -> vector<10x1xf32>
    %163 = vector.broadcast %162 : vector<10x1xf32> to vector<10x10xf32>
    %164 = arith.mulf %159, %163 : vector<10x10xf32>
    %cst_57 = arith.constant dense<0.000000e+00> : vector<10x32xf32>
    %165 = tpu.matmul %164, %83, %cst_57 {dimension_numbers = #tpu.dot_dimension_numbers<[1], [0], [0], [1], [0, 0, 1, 1], [], []>} : vector<10x10xf32>, vector<10x32xf32>, vector<10x32xf32> -> vector<10x32xf32>
    %166 = vector.broadcast %147 : vector<1x32xf32> to vector<10x32xf32>
    %167 = arith.mulf %165, %166 : vector<10x32xf32>
    %168 = arith.addf %140, %167 : vector<10x32xf32>
    %c24_i32_58 = arith.constant 24 : i32
    %169 = vector.broadcast %c24_i32_58 : i32 to vector<1x32xi32>
    %170 = arith.cmpi sge, %5, %169 : vector<1x32xi32>
    %c32_i32 = arith.constant 32 : i32
    %171 = vector.broadcast %c32_i32 : i32 to vector<1x32xi32>
    %172 = arith.cmpi slt, %5, %171 : vector<1x32xi32>
    %173 = arith.andi %170, %172 : vector<1x32xi1>
    %174 = arith.extui %173 : vector<1x32xi1> to vector<1x32xi32>
    %175 = arith.sitofp %174 : vector<1x32xi32> to vector<1x32xf32>
    %176 = vector.broadcast %175 : vector<1x32xf32> to vector<10x32xf32>
    %177 = arith.mulf %81, %176 : vector<10x32xf32>
    %178 = tpu.transpose %82, [1, 0] : vector<10x32xf32> -> vector<32x10xf32>
    %cst_59 = arith.constant dense<0.000000e+00> : vector<10x10xf32>
    %179 = tpu.matmul %177, %178, %cst_59 {dimension_numbers = #tpu.dot_dimension_numbers<[1], [0], [0], [1], [0, 0, 1, 1], [], []>} : vector<10x32xf32>, vector<32x10xf32>, vector<10x10xf32> -> vector<10x10xf32>
    %cst_60 = arith.constant 0.353553385 : f32
    %180 = vector.broadcast %cst_60 : f32 to vector<10x10xf32>
    %181 = arith.mulf %179, %180 : vector<10x10xf32>
    %182 = arith.addf %181, %35 : vector<10x10xf32>
    %cst_61 = arith.constant dense<0xFF800000> : vector<10xf32>
    %183 = vector.multi_reduction <maximumf>, %182, %cst_61 [1] : vector<10x10xf32> to vector<10xf32>
    %184 = vector.shape_cast %183 : vector<10xf32> to vector<10x1xf32>
    %185 = vector.broadcast %184 : vector<10x1xf32> to vector<10x10xf32>
    %186 = arith.subf %182, %185 : vector<10x10xf32>
    %187 = math.exp %186 : vector<10x10xf32>
    %cst_62 = arith.constant dense<0.000000e+00> : vector<10xf32>
    %188 = vector.multi_reduction <add>, %187, %cst_62 [1] : vector<10x10xf32> to vector<10xf32>
    %189 = vector.shape_cast %188 : vector<10xf32> to vector<10x1xf32>
    %190 = tpu.reciprocal %189 {approx = true} : vector<10x1xf32> -> vector<10x1xf32>
    %191 = vector.broadcast %190 : vector<10x1xf32> to vector<10x10xf32>
    %192 = arith.mulf %187, %191 : vector<10x10xf32>
    %cst_63 = arith.constant dense<0.000000e+00> : vector<10x32xf32>
    %193 = tpu.matmul %192, %83, %cst_63 {dimension_numbers = #tpu.dot_dimension_numbers<[1], [0], [0], [1], [0, 0, 1, 1], [], []>} : vector<10x10xf32>, vector<10x32xf32>, vector<10x32xf32> -> vector<10x32xf32>
    %194 = vector.broadcast %175 : vector<1x32xf32> to vector<10x32xf32>
    %195 = arith.mulf %193, %194 : vector<10x32xf32>
    %196 = arith.addf %168, %195 : vector<10x32xf32>
    %cst_64 = arith.constant dense<0.000000e+00> : vector<10x32xf32>
    %197 = tpu.matmul %196, %41, %cst_64 {dimension_numbers = #tpu.dot_dimension_numbers<[1], [0], [0], [1], [0, 0, 1, 1], [], []>} : vector<10x32xf32>, vector<32x32xf32>, vector<10x32xf32> -> vector<10x32xf32>
    %198 = vector.broadcast %54 : vector<1x32xf32> to vector<10x32xf32>
    %199 = arith.addf %197, %198 : vector<10x32xf32>
    %200 = arith.addf %4, %199 : vector<10x32xf32>
    %cst_65 = arith.constant dense<0.000000e+00> : vector<10xf32>
    %201 = vector.multi_reduction <add>, %200, %cst_65 [1] : vector<10x32xf32> to vector<10xf32>
    %202 = vector.shape_cast %201 : vector<10xf32> to vector<10x1xf32>
    %cst_66 = arith.constant 3.200000e+01 : f32
    %203 = vector.broadcast %cst_66 : f32 to vector<10x1xf32>
    %204 = arith.divf %202, %203 : vector<10x1xf32>
    %205 = vector.broadcast %204 : vector<10x1xf32> to vector<10x32xf32>
    %206 = arith.subf %200, %205 : vector<10x32xf32>
    %207 = arith.mulf %206, %206 : vector<10x32xf32>
    %cst_67 = arith.constant dense<0.000000e+00> : vector<10xf32>
    %208 = vector.multi_reduction <add>, %207, %cst_67 [1] : vector<10x32xf32> to vector<10xf32>
    %209 = vector.shape_cast %208 : vector<10xf32> to vector<10x1xf32>
    %cst_68 = arith.constant 3.200000e+01 : f32
    %210 = vector.broadcast %cst_68 : f32 to vector<10x1xf32>
    %211 = arith.divf %209, %210 : vector<10x1xf32>
    %212 = vector.broadcast %204 : vector<10x1xf32> to vector<10x32xf32>
    %213 = arith.subf %200, %212 : vector<10x32xf32>
    %cst_69 = arith.constant 9.99999996E-13 : f32
    %214 = vector.broadcast %cst_69 : f32 to vector<10x1xf32>
    %215 = arith.addf %211, %214 : vector<10x1xf32>
    %216 = math.rsqrt %215 : vector<10x1xf32>
    %217 = vector.broadcast %216 : vector<10x1xf32> to vector<10x32xf32>
    %218 = arith.mulf %213, %217 : vector<10x32xf32>
    %219 = vector.broadcast %52 : vector<1x32xf32> to vector<10x32xf32>
    %220 = arith.mulf %218, %219 : vector<10x32xf32>
    %221 = vector.broadcast %53 : vector<1x32xf32> to vector<10x32xf32>
    %222 = arith.addf %220, %221 : vector<10x32xf32>
    %cst_70 = arith.constant dense<0.000000e+00> : vector<10x64xf32>
    %223 = tpu.matmul %222, %45, %cst_70 {dimension_numbers = #tpu.dot_dimension_numbers<[1], [0], [0], [1], [0, 0, 1, 1], [], []>} : vector<10x32xf32>, vector<32x64xf32>, vector<10x64xf32> -> vector<10x64xf32>
    %224 = vector.broadcast %47 : vector<1x64xf32> to vector<10x64xf32>
    %225 = arith.addf %223, %224 : vector<10x64xf32>
    %cst_71 = arith.constant 5.000000e-01 : f32
    %226 = vector.broadcast %cst_71 : f32 to vector<10x64xf32>
    %227 = arith.mulf %226, %225 : vector<10x64xf32>
    %cst_72 = arith.constant 4.471500e-02 : f32
    %228 = vector.broadcast %cst_72 : f32 to vector<10x64xf32>
    %229 = arith.mulf %228, %225 : vector<10x64xf32>
    %230 = arith.mulf %229, %225 : vector<10x64xf32>
    %231 = arith.mulf %230, %225 : vector<10x64xf32>
    %232 = arith.addf %225, %231 : vector<10x64xf32>
    %cst_73 = arith.constant 0.797884583 : f32
    %233 = vector.broadcast %cst_73 : f32 to vector<10x64xf32>
    %234 = arith.mulf %233, %232 : vector<10x64xf32>
    %235 = math.tanh %234 : vector<10x64xf32>
    %cst_74 = arith.constant 1.000000e+00 : f32
    %236 = vector.broadcast %cst_74 : f32 to vector<10x64xf32>
    %237 = arith.addf %236, %235 : vector<10x64xf32>
    %238 = arith.mulf %227, %237 : vector<10x64xf32>
    %cst_75 = arith.constant dense<0.000000e+00> : vector<10x32xf32>
    %239 = tpu.matmul %238, %49, %cst_75 {dimension_numbers = #tpu.dot_dimension_numbers<[1], [0], [0], [1], [0, 0, 1, 1], [], []>} : vector<10x64xf32>, vector<64x32xf32>, vector<10x32xf32> -> vector<10x32xf32>
    %240 = arith.addf %200, %239 : vector<10x32xf32>
    %241 = vector.broadcast %55 : vector<1x32xf32> to vector<10x32xf32>
    %242 = arith.addf %240, %241 : vector<10x32xf32>
    %c1 = arith.constant 1 : index
    %c0_76 = arith.constant 0 : index
    %c0_77 = arith.constant 0 : index
    %243 = vector.load %arg5[%c1, %c0_76, %c0_77] : memref<2x32x96xf32, #tpu.memory_space<vmem>>, vector<1x32x96xf32>
    %244 = vector.shape_cast %243 : vector<1x32x96xf32> to vector<32x96xf32>
    %c1_78 = arith.constant 1 : index
    %c0_79 = arith.constant 0 : index
    %c0_80 = arith.constant 0 : index
    %245 = vector.load %arg6[%c1_78, %c0_79, %c0_80] : memref<2x1x96xf32, #tpu.memory_space<vmem>>, vector<1x1x96xf32>
    %246 = vector.shape_cast %245 : vector<1x1x96xf32> to vector<1x96xf32>
    %c1_81 = arith.constant 1 : index
    %c0_82 = arith.constant 0 : index
    %c0_83 = arith.constant 0 : index
    %247 = vector.load %arg7[%c1_81, %c0_82, %c0_83] : memref<2x32x32xf32, #tpu.memory_space<vmem>>, vector<1x32x32xf32>
    %248 = vector.shape_cast %247 : vector<1x32x32xf32> to vector<32x32xf32>
    %c1_84 = arith.constant 1 : index
    %c0_85 = arith.constant 0 : index
    %c0_86 = arith.constant 0 : index
    %249 = vector.load %arg8[%c1_84, %c0_85, %c0_86] : memref<2x6x32xf32, #tpu.memory_space<vmem>>, vector<1x6x32xf32>
    %250 = vector.shape_cast %249 : vector<1x6x32xf32> to vector<6x32xf32>
    %c1_87 = arith.constant 1 : index
    %c0_88 = arith.constant 0 : index
    %c0_89 = arith.constant 0 : index
    %251 = vector.load %arg9[%c1_87, %c0_88, %c0_89] : memref<2x32x64xf32, #tpu.memory_space<vmem>>, vector<1x32x64xf32>
    %252 = vector.shape_cast %251 : vector<1x32x64xf32> to vector<32x64xf32>
    %c1_90 = arith.constant 1 : index
    %c0_91 = arith.constant 0 : index
    %c0_92 = arith.constant 0 : index
    %253 = vector.load %arg10[%c1_90, %c0_91, %c0_92] : memref<2x1x64xf32, #tpu.memory_space<vmem>>, vector<1x1x64xf32>
    %254 = vector.shape_cast %253 : vector<1x1x64xf32> to vector<1x64xf32>
    %c1_93 = arith.constant 1 : index
    %c0_94 = arith.constant 0 : index
    %c0_95 = arith.constant 0 : index
    %255 = vector.load %arg11[%c1_93, %c0_94, %c0_95] : memref<2x64x32xf32, #tpu.memory_space<vmem>>, vector<1x64x32xf32>
    %256 = vector.shape_cast %255 : vector<1x64x32xf32> to vector<64x32xf32>
    %257 = vector.extract_strided_slice %250 {offsets = [0, 0], sizes = [1, 32], strides = [1, 1]} : vector<6x32xf32> to vector<1x32xf32>
    %258 = vector.extract_strided_slice %250 {offsets = [1, 0], sizes = [1, 32], strides = [1, 1]} : vector<6x32xf32> to vector<1x32xf32>
    %259 = vector.extract_strided_slice %250 {offsets = [2, 0], sizes = [1, 32], strides = [1, 1]} : vector<6x32xf32> to vector<1x32xf32>
    %260 = vector.extract_strided_slice %250 {offsets = [3, 0], sizes = [1, 32], strides = [1, 1]} : vector<6x32xf32> to vector<1x32xf32>
    %261 = vector.extract_strided_slice %250 {offsets = [4, 0], sizes = [1, 32], strides = [1, 1]} : vector<6x32xf32> to vector<1x32xf32>
    %262 = vector.extract_strided_slice %250 {offsets = [5, 0], sizes = [1, 32], strides = [1, 1]} : vector<6x32xf32> to vector<1x32xf32>
    %cst_96 = arith.constant dense<0.000000e+00> : vector<10xf32>
    %263 = vector.multi_reduction <add>, %242, %cst_96 [1] : vector<10x32xf32> to vector<10xf32>
    %264 = vector.shape_cast %263 : vector<10xf32> to vector<10x1xf32>
    %cst_97 = arith.constant 3.200000e+01 : f32
    %265 = vector.broadcast %cst_97 : f32 to vector<10x1xf32>
    %266 = arith.divf %264, %265 : vector<10x1xf32>
    %267 = vector.broadcast %266 : vector<10x1xf32> to vector<10x32xf32>
    %268 = arith.subf %242, %267 : vector<10x32xf32>
    %269 = arith.mulf %268, %268 : vector<10x32xf32>
    %cst_98 = arith.constant dense<0.000000e+00> : vector<10xf32>
    %270 = vector.multi_reduction <add>, %269, %cst_98 [1] : vector<10x32xf32> to vector<10xf32>
    %271 = vector.shape_cast %270 : vector<10xf32> to vector<10x1xf32>
    %cst_99 = arith.constant 3.200000e+01 : f32
    %272 = vector.broadcast %cst_99 : f32 to vector<10x1xf32>
    %273 = arith.divf %271, %272 : vector<10x1xf32>
    %274 = vector.broadcast %266 : vector<10x1xf32> to vector<10x32xf32>
    %275 = arith.subf %242, %274 : vector<10x32xf32>
    %cst_100 = arith.constant 9.99999996E-13 : f32
    %276 = vector.broadcast %cst_100 : f32 to vector<10x1xf32>
    %277 = arith.addf %273, %276 : vector<10x1xf32>
    %278 = math.rsqrt %277 : vector<10x1xf32>
    %279 = vector.broadcast %278 : vector<10x1xf32> to vector<10x32xf32>
    %280 = arith.mulf %275, %279 : vector<10x32xf32>
    %281 = vector.broadcast %257 : vector<1x32xf32> to vector<10x32xf32>
    %282 = arith.mulf %280, %281 : vector<10x32xf32>
    %283 = vector.broadcast %258 : vector<1x32xf32> to vector<10x32xf32>
    %284 = arith.addf %282, %283 : vector<10x32xf32>
    %cst_101 = arith.constant dense<0.000000e+00> : vector<10x96xf32>
    %285 = tpu.matmul %284, %244, %cst_101 {dimension_numbers = #tpu.dot_dimension_numbers<[1], [0], [0], [1], [0, 0, 1, 1], [], []>} : vector<10x32xf32>, vector<32x96xf32>, vector<10x96xf32> -> vector<10x96xf32>
    %286 = vector.broadcast %246 : vector<1x96xf32> to vector<10x96xf32>
    %287 = arith.addf %285, %286 : vector<10x96xf32>
    %288 = vector.extract_strided_slice %287 {offsets = [0, 0], sizes = [10, 32], strides = [1, 1]} : vector<10x96xf32> to vector<10x32xf32>
    %289 = vector.extract_strided_slice %287 {offsets = [0, 32], sizes = [10, 32], strides = [1, 1]} : vector<10x96xf32> to vector<10x32xf32>
    %290 = vector.extract_strided_slice %287 {offsets = [0, 64], sizes = [10, 32], strides = [1, 1]} : vector<10x96xf32> to vector<10x32xf32>
    %cst_102 = arith.constant 0.000000e+00 : f32
    %291 = vector.broadcast %cst_102 : f32 to vector<10x32xf32>
    %c0_i32_103 = arith.constant 0 : i32
    %292 = vector.broadcast %c0_i32_103 : i32 to vector<1x32xi32>
    %293 = arith.cmpi sge, %5, %292 : vector<1x32xi32>
    %c8_i32_104 = arith.constant 8 : i32
    %294 = vector.broadcast %c8_i32_104 : i32 to vector<1x32xi32>
    %295 = arith.cmpi slt, %5, %294 : vector<1x32xi32>
    %296 = arith.andi %293, %295 : vector<1x32xi1>
    %297 = arith.extui %296 : vector<1x32xi1> to vector<1x32xi32>
    %298 = arith.sitofp %297 : vector<1x32xi32> to vector<1x32xf32>
    %299 = vector.broadcast %298 : vector<1x32xf32> to vector<10x32xf32>
    %300 = arith.mulf %288, %299 : vector<10x32xf32>
    %301 = tpu.transpose %289, [1, 0] : vector<10x32xf32> -> vector<32x10xf32>
    %cst_105 = arith.constant dense<0.000000e+00> : vector<10x10xf32>
    %302 = tpu.matmul %300, %301, %cst_105 {dimension_numbers = #tpu.dot_dimension_numbers<[1], [0], [0], [1], [0, 0, 1, 1], [], []>} : vector<10x32xf32>, vector<32x10xf32>, vector<10x10xf32> -> vector<10x10xf32>
    %cst_106 = arith.constant 0.353553385 : f32
    %303 = vector.broadcast %cst_106 : f32 to vector<10x10xf32>
    %304 = arith.mulf %302, %303 : vector<10x10xf32>
    %305 = arith.addf %304, %35 : vector<10x10xf32>
    %cst_107 = arith.constant dense<0xFF800000> : vector<10xf32>
    %306 = vector.multi_reduction <maximumf>, %305, %cst_107 [1] : vector<10x10xf32> to vector<10xf32>
    %307 = vector.shape_cast %306 : vector<10xf32> to vector<10x1xf32>
    %308 = vector.broadcast %307 : vector<10x1xf32> to vector<10x10xf32>
    %309 = arith.subf %305, %308 : vector<10x10xf32>
    %310 = math.exp %309 : vector<10x10xf32>
    %cst_108 = arith.constant dense<0.000000e+00> : vector<10xf32>
    %311 = vector.multi_reduction <add>, %310, %cst_108 [1] : vector<10x10xf32> to vector<10xf32>
    %312 = vector.shape_cast %311 : vector<10xf32> to vector<10x1xf32>
    %313 = tpu.reciprocal %312 {approx = true} : vector<10x1xf32> -> vector<10x1xf32>
    %314 = vector.broadcast %313 : vector<10x1xf32> to vector<10x10xf32>
    %315 = arith.mulf %310, %314 : vector<10x10xf32>
    %cst_109 = arith.constant dense<0.000000e+00> : vector<10x32xf32>
    %316 = tpu.matmul %315, %290, %cst_109 {dimension_numbers = #tpu.dot_dimension_numbers<[1], [0], [0], [1], [0, 0, 1, 1], [], []>} : vector<10x10xf32>, vector<10x32xf32>, vector<10x32xf32> -> vector<10x32xf32>
    %317 = vector.broadcast %298 : vector<1x32xf32> to vector<10x32xf32>
    %318 = arith.mulf %316, %317 : vector<10x32xf32>
    %319 = arith.addf %291, %318 : vector<10x32xf32>
    %c8_i32_110 = arith.constant 8 : i32
    %320 = vector.broadcast %c8_i32_110 : i32 to vector<1x32xi32>
    %321 = arith.cmpi sge, %5, %320 : vector<1x32xi32>
    %c16_i32_111 = arith.constant 16 : i32
    %322 = vector.broadcast %c16_i32_111 : i32 to vector<1x32xi32>
    %323 = arith.cmpi slt, %5, %322 : vector<1x32xi32>
    %324 = arith.andi %321, %323 : vector<1x32xi1>
    %325 = arith.extui %324 : vector<1x32xi1> to vector<1x32xi32>
    %326 = arith.sitofp %325 : vector<1x32xi32> to vector<1x32xf32>
    %327 = vector.broadcast %326 : vector<1x32xf32> to vector<10x32xf32>
    %328 = arith.mulf %288, %327 : vector<10x32xf32>
    %329 = tpu.transpose %289, [1, 0] : vector<10x32xf32> -> vector<32x10xf32>
    %cst_112 = arith.constant dense<0.000000e+00> : vector<10x10xf32>
    %330 = tpu.matmul %328, %329, %cst_112 {dimension_numbers = #tpu.dot_dimension_numbers<[1], [0], [0], [1], [0, 0, 1, 1], [], []>} : vector<10x32xf32>, vector<32x10xf32>, vector<10x10xf32> -> vector<10x10xf32>
    %cst_113 = arith.constant 0.353553385 : f32
    %331 = vector.broadcast %cst_113 : f32 to vector<10x10xf32>
    %332 = arith.mulf %330, %331 : vector<10x10xf32>
    %333 = arith.addf %332, %35 : vector<10x10xf32>
    %cst_114 = arith.constant dense<0xFF800000> : vector<10xf32>
    %334 = vector.multi_reduction <maximumf>, %333, %cst_114 [1] : vector<10x10xf32> to vector<10xf32>
    %335 = vector.shape_cast %334 : vector<10xf32> to vector<10x1xf32>
    %336 = vector.broadcast %335 : vector<10x1xf32> to vector<10x10xf32>
    %337 = arith.subf %333, %336 : vector<10x10xf32>
    %338 = math.exp %337 : vector<10x10xf32>
    %cst_115 = arith.constant dense<0.000000e+00> : vector<10xf32>
    %339 = vector.multi_reduction <add>, %338, %cst_115 [1] : vector<10x10xf32> to vector<10xf32>
    %340 = vector.shape_cast %339 : vector<10xf32> to vector<10x1xf32>
    %341 = tpu.reciprocal %340 {approx = true} : vector<10x1xf32> -> vector<10x1xf32>
    %342 = vector.broadcast %341 : vector<10x1xf32> to vector<10x10xf32>
    %343 = arith.mulf %338, %342 : vector<10x10xf32>
    %cst_116 = arith.constant dense<0.000000e+00> : vector<10x32xf32>
    %344 = tpu.matmul %343, %290, %cst_116 {dimension_numbers = #tpu.dot_dimension_numbers<[1], [0], [0], [1], [0, 0, 1, 1], [], []>} : vector<10x10xf32>, vector<10x32xf32>, vector<10x32xf32> -> vector<10x32xf32>
    %345 = vector.broadcast %326 : vector<1x32xf32> to vector<10x32xf32>
    %346 = arith.mulf %344, %345 : vector<10x32xf32>
    %347 = arith.addf %319, %346 : vector<10x32xf32>
    %c16_i32_117 = arith.constant 16 : i32
    %348 = vector.broadcast %c16_i32_117 : i32 to vector<1x32xi32>
    %349 = arith.cmpi sge, %5, %348 : vector<1x32xi32>
    %c24_i32_118 = arith.constant 24 : i32
    %350 = vector.broadcast %c24_i32_118 : i32 to vector<1x32xi32>
    %351 = arith.cmpi slt, %5, %350 : vector<1x32xi32>
    %352 = arith.andi %349, %351 : vector<1x32xi1>
    %353 = arith.extui %352 : vector<1x32xi1> to vector<1x32xi32>
    %354 = arith.sitofp %353 : vector<1x32xi32> to vector<1x32xf32>
    %355 = vector.broadcast %354 : vector<1x32xf32> to vector<10x32xf32>
    %356 = arith.mulf %288, %355 : vector<10x32xf32>
    %357 = tpu.transpose %289, [1, 0] : vector<10x32xf32> -> vector<32x10xf32>
    %cst_119 = arith.constant dense<0.000000e+00> : vector<10x10xf32>
    %358 = tpu.matmul %356, %357, %cst_119 {dimension_numbers = #tpu.dot_dimension_numbers<[1], [0], [0], [1], [0, 0, 1, 1], [], []>} : vector<10x32xf32>, vector<32x10xf32>, vector<10x10xf32> -> vector<10x10xf32>
    %cst_120 = arith.constant 0.353553385 : f32
    %359 = vector.broadcast %cst_120 : f32 to vector<10x10xf32>
    %360 = arith.mulf %358, %359 : vector<10x10xf32>
    %361 = arith.addf %360, %35 : vector<10x10xf32>
    %cst_121 = arith.constant dense<0xFF800000> : vector<10xf32>
    %362 = vector.multi_reduction <maximumf>, %361, %cst_121 [1] : vector<10x10xf32> to vector<10xf32>
    %363 = vector.shape_cast %362 : vector<10xf32> to vector<10x1xf32>
    %364 = vector.broadcast %363 : vector<10x1xf32> to vector<10x10xf32>
    %365 = arith.subf %361, %364 : vector<10x10xf32>
    %366 = math.exp %365 : vector<10x10xf32>
    %cst_122 = arith.constant dense<0.000000e+00> : vector<10xf32>
    %367 = vector.multi_reduction <add>, %366, %cst_122 [1] : vector<10x10xf32> to vector<10xf32>
    %368 = vector.shape_cast %367 : vector<10xf32> to vector<10x1xf32>
    %369 = tpu.reciprocal %368 {approx = true} : vector<10x1xf32> -> vector<10x1xf32>
    %370 = vector.broadcast %369 : vector<10x1xf32> to vector<10x10xf32>
    %371 = arith.mulf %366, %370 : vector<10x10xf32>
    %cst_123 = arith.constant dense<0.000000e+00> : vector<10x32xf32>
    %372 = tpu.matmul %371, %290, %cst_123 {dimension_numbers = #tpu.dot_dimension_numbers<[1], [0], [0], [1], [0, 0, 1, 1], [], []>} : vector<10x10xf32>, vector<10x32xf32>, vector<10x32xf32> -> vector<10x32xf32>
    %373 = vector.broadcast %354 : vector<1x32xf32> to vector<10x32xf32>
    %374 = arith.mulf %372, %373 : vector<10x32xf32>
    %375 = arith.addf %347, %374 : vector<10x32xf32>
    %c24_i32_124 = arith.constant 24 : i32
    %376 = vector.broadcast %c24_i32_124 : i32 to vector<1x32xi32>
    %377 = arith.cmpi sge, %5, %376 : vector<1x32xi32>
    %c32_i32_125 = arith.constant 32 : i32
    %378 = vector.broadcast %c32_i32_125 : i32 to vector<1x32xi32>
    %379 = arith.cmpi slt, %5, %378 : vector<1x32xi32>
    %380 = arith.andi %377, %379 : vector<1x32xi1>
    %381 = arith.extui %380 : vector<1x32xi1> to vector<1x32xi32>
    %382 = arith.sitofp %381 : vector<1x32xi32> to vector<1x32xf32>
    %383 = vector.broadcast %382 : vector<1x32xf32> to vector<10x32xf32>
    %384 = arith.mulf %288, %383 : vector<10x32xf32>
    %385 = tpu.transpose %289, [1, 0] : vector<10x32xf32> -> vector<32x10xf32>
    %cst_126 = arith.constant dense<0.000000e+00> : vector<10x10xf32>
    %386 = tpu.matmul %384, %385, %cst_126 {dimension_numbers = #tpu.dot_dimension_numbers<[1], [0], [0], [1], [0, 0, 1, 1], [], []>} : vector<10x32xf32>, vector<32x10xf32>, vector<10x10xf32> -> vector<10x10xf32>
    %cst_127 = arith.constant 0.353553385 : f32
    %387 = vector.broadcast %cst_127 : f32 to vector<10x10xf32>
    %388 = arith.mulf %386, %387 : vector<10x10xf32>
    %389 = arith.addf %388, %35 : vector<10x10xf32>
    %cst_128 = arith.constant dense<0xFF800000> : vector<10xf32>
    %390 = vector.multi_reduction <maximumf>, %389, %cst_128 [1] : vector<10x10xf32> to vector<10xf32>
    %391 = vector.shape_cast %390 : vector<10xf32> to vector<10x1xf32>
    %392 = vector.broadcast %391 : vector<10x1xf32> to vector<10x10xf32>
    %393 = arith.subf %389, %392 : vector<10x10xf32>
    %394 = math.exp %393 : vector<10x10xf32>
    %cst_129 = arith.constant dense<0.000000e+00> : vector<10xf32>
    %395 = vector.multi_reduction <add>, %394, %cst_129 [1] : vector<10x10xf32> to vector<10xf32>
    %396 = vector.shape_cast %395 : vector<10xf32> to vector<10x1xf32>
    %397 = tpu.reciprocal %396 {approx = true} : vector<10x1xf32> -> vector<10x1xf32>
    %398 = vector.broadcast %397 : vector<10x1xf32> to vector<10x10xf32>
    %399 = arith.mulf %394, %398 : vector<10x10xf32>
    %cst_130 = arith.constant dense<0.000000e+00> : vector<10x32xf32>
    %400 = tpu.matmul %399, %290, %cst_130 {dimension_numbers = #tpu.dot_dimension_numbers<[1], [0], [0], [1], [0, 0, 1, 1], [], []>} : vector<10x10xf32>, vector<10x32xf32>, vector<10x32xf32> -> vector<10x32xf32>
    %401 = vector.broadcast %382 : vector<1x32xf32> to vector<10x32xf32>
    %402 = arith.mulf %400, %401 : vector<10x32xf32>
    %403 = arith.addf %375, %402 : vector<10x32xf32>
    %cst_131 = arith.constant dense<0.000000e+00> : vector<10x32xf32>
    %404 = tpu.matmul %403, %248, %cst_131 {dimension_numbers = #tpu.dot_dimension_numbers<[1], [0], [0], [1], [0, 0, 1, 1], [], []>} : vector<10x32xf32>, vector<32x32xf32>, vector<10x32xf32> -> vector<10x32xf32>
    %405 = vector.broadcast %261 : vector<1x32xf32> to vector<10x32xf32>
    %406 = arith.addf %404, %405 : vector<10x32xf32>
    %407 = arith.addf %242, %406 : vector<10x32xf32>
    %cst_132 = arith.constant dense<0.000000e+00> : vector<10xf32>
    %408 = vector.multi_reduction <add>, %407, %cst_132 [1] : vector<10x32xf32> to vector<10xf32>
    %409 = vector.shape_cast %408 : vector<10xf32> to vector<10x1xf32>
    %cst_133 = arith.constant 3.200000e+01 : f32
    %410 = vector.broadcast %cst_133 : f32 to vector<10x1xf32>
    %411 = arith.divf %409, %410 : vector<10x1xf32>
    %412 = vector.broadcast %411 : vector<10x1xf32> to vector<10x32xf32>
    %413 = arith.subf %407, %412 : vector<10x32xf32>
    %414 = arith.mulf %413, %413 : vector<10x32xf32>
    %cst_134 = arith.constant dense<0.000000e+00> : vector<10xf32>
    %415 = vector.multi_reduction <add>, %414, %cst_134 [1] : vector<10x32xf32> to vector<10xf32>
    %416 = vector.shape_cast %415 : vector<10xf32> to vector<10x1xf32>
    %cst_135 = arith.constant 3.200000e+01 : f32
    %417 = vector.broadcast %cst_135 : f32 to vector<10x1xf32>
    %418 = arith.divf %416, %417 : vector<10x1xf32>
    %419 = vector.broadcast %411 : vector<10x1xf32> to vector<10x32xf32>
    %420 = arith.subf %407, %419 : vector<10x32xf32>
    %cst_136 = arith.constant 9.99999996E-13 : f32
    %421 = vector.broadcast %cst_136 : f32 to vector<10x1xf32>
    %422 = arith.addf %418, %421 : vector<10x1xf32>
    %423 = math.rsqrt %422 : vector<10x1xf32>
    %424 = vector.broadcast %423 : vector<10x1xf32> to vector<10x32xf32>
    %425 = arith.mulf %420, %424 : vector<10x32xf32>
    %426 = vector.broadcast %259 : vector<1x32xf32> to vector<10x32xf32>
    %427 = arith.mulf %425, %426 : vector<10x32xf32>
    %428 = vector.broadcast %260 : vector<1x32xf32> to vector<10x32xf32>
    %429 = arith.addf %427, %428 : vector<10x32xf32>
    %cst_137 = arith.constant dense<0.000000e+00> : vector<10x64xf32>
    %430 = tpu.matmul %429, %252, %cst_137 {dimension_numbers = #tpu.dot_dimension_numbers<[1], [0], [0], [1], [0, 0, 1, 1], [], []>} : vector<10x32xf32>, vector<32x64xf32>, vector<10x64xf32> -> vector<10x64xf32>
    %431 = vector.broadcast %254 : vector<1x64xf32> to vector<10x64xf32>
    %432 = arith.addf %430, %431 : vector<10x64xf32>
    %cst_138 = arith.constant 5.000000e-01 : f32
    %433 = vector.broadcast %cst_138 : f32 to vector<10x64xf32>
    %434 = arith.mulf %433, %432 : vector<10x64xf32>
    %cst_139 = arith.constant 4.471500e-02 : f32
    %435 = vector.broadcast %cst_139 : f32 to vector<10x64xf32>
    %436 = arith.mulf %435, %432 : vector<10x64xf32>
    %437 = arith.mulf %436, %432 : vector<10x64xf32>
    %438 = arith.mulf %437, %432 : vector<10x64xf32>
    %439 = arith.addf %432, %438 : vector<10x64xf32>
    %cst_140 = arith.constant 0.797884583 : f32
    %440 = vector.broadcast %cst_140 : f32 to vector<10x64xf32>
    %441 = arith.mulf %440, %439 : vector<10x64xf32>
    %442 = math.tanh %441 : vector<10x64xf32>
    %cst_141 = arith.constant 1.000000e+00 : f32
    %443 = vector.broadcast %cst_141 : f32 to vector<10x64xf32>
    %444 = arith.addf %443, %442 : vector<10x64xf32>
    %445 = arith.mulf %434, %444 : vector<10x64xf32>
    %cst_142 = arith.constant dense<0.000000e+00> : vector<10x32xf32>
    %446 = tpu.matmul %445, %256, %cst_142 {dimension_numbers = #tpu.dot_dimension_numbers<[1], [0], [0], [1], [0, 0, 1, 1], [], []>} : vector<10x64xf32>, vector<64x32xf32>, vector<10x32xf32> -> vector<10x32xf32>
    %447 = arith.addf %407, %446 : vector<10x32xf32>
    %448 = vector.broadcast %262 : vector<1x32xf32> to vector<10x32xf32>
    %449 = arith.addf %447, %448 : vector<10x32xf32>
    %450 = tpu.iota {dimensions = array<i32: 0>} : vector<2x10xi32>
    %451 = tpu.iota {dimensions = array<i32: 1>} : vector<2x10xi32>
    %c5_i32_143 = arith.constant 5 : i32
    %452 = vector.broadcast %c5_i32_143 : i32 to vector<2x10xi32>
    %453 = arith.muli %450, %452 : vector<2x10xi32>
    %454 = arith.cmpi eq, %451, %453 : vector<2x10xi32>
    %455 = arith.extui %454 : vector<2x10xi1> to vector<2x10xi32>
    %456 = arith.sitofp %455 : vector<2x10xi32> to vector<2x10xf32>
    %cst_144 = arith.constant dense<0.000000e+00> : vector<2x32xf32>
    %457 = tpu.matmul %456, %449, %cst_144 {dimension_numbers = #tpu.dot_dimension_numbers<[1], [0], [0], [1], [0, 0, 1, 1], [], []>} : vector<2x10xf32>, vector<10x32xf32>, vector<2x32xf32> -> vector<2x32xf32>
    %c0_145 = arith.constant 0 : index
    %c0_146 = arith.constant 0 : index
    %458 = vector.load %arg12[%c0_145, %c0_146] : memref<2x32xf32, #tpu.memory_space<vmem>>, vector<1x32xf32>
    %c1_147 = arith.constant 1 : index
    %c0_148 = arith.constant 0 : index
    %459 = vector.load %arg12[%c1_147, %c0_148] : memref<2x32xf32, #tpu.memory_space<vmem>>, vector<1x32xf32>
    %cst_149 = arith.constant dense<0.000000e+00> : vector<2xf32>
    %460 = vector.multi_reduction <add>, %457, %cst_149 [1] : vector<2x32xf32> to vector<2xf32>
    %461 = vector.shape_cast %460 : vector<2xf32> to vector<2x1xf32>
    %cst_150 = arith.constant 3.200000e+01 : f32
    %462 = vector.broadcast %cst_150 : f32 to vector<2x1xf32>
    %463 = arith.divf %461, %462 : vector<2x1xf32>
    %464 = vector.broadcast %463 : vector<2x1xf32> to vector<2x32xf32>
    %465 = arith.subf %457, %464 : vector<2x32xf32>
    %466 = arith.mulf %465, %465 : vector<2x32xf32>
    %cst_151 = arith.constant dense<0.000000e+00> : vector<2xf32>
    %467 = vector.multi_reduction <add>, %466, %cst_151 [1] : vector<2x32xf32> to vector<2xf32>
    %468 = vector.shape_cast %467 : vector<2xf32> to vector<2x1xf32>
    %cst_152 = arith.constant 3.200000e+01 : f32
    %469 = vector.broadcast %cst_152 : f32 to vector<2x1xf32>
    %470 = arith.divf %468, %469 : vector<2x1xf32>
    %471 = vector.broadcast %463 : vector<2x1xf32> to vector<2x32xf32>
    %472 = arith.subf %457, %471 : vector<2x32xf32>
    %cst_153 = arith.constant 9.99999996E-13 : f32
    %473 = vector.broadcast %cst_153 : f32 to vector<2x1xf32>
    %474 = arith.addf %470, %473 : vector<2x1xf32>
    %475 = math.rsqrt %474 : vector<2x1xf32>
    %476 = vector.broadcast %475 : vector<2x1xf32> to vector<2x32xf32>
    %477 = arith.mulf %472, %476 : vector<2x32xf32>
    %478 = vector.broadcast %458 : vector<1x32xf32> to vector<2x32xf32>
    %479 = arith.mulf %477, %478 : vector<2x32xf32>
    %480 = vector.broadcast %459 : vector<1x32xf32> to vector<2x32xf32>
    %481 = arith.addf %479, %480 : vector<2x32xf32>
    %c0_154 = arith.constant 0 : index
    %c0_155 = arith.constant 0 : index
    %482 = vector.load %arg13[%c0_154, %c0_155] : memref<32x128xf32, #tpu.memory_space<vmem>>, vector<32x128xf32>
    %cst_156 = arith.constant dense<0.000000e+00> : vector<2x128xf32>
    %483 = tpu.matmul %481, %482, %cst_156 {dimension_numbers = #tpu.dot_dimension_numbers<[1], [0], [0], [1], [0, 0, 1, 1], [], []>} : vector<2x32xf32>, vector<32x128xf32>, vector<2x128xf32> -> vector<2x128xf32>
    %c0_157 = arith.constant 0 : index
    %c0_158 = arith.constant 0 : index
    %484 = vector.load %arg14[%c0_157, %c0_158] : memref<1x128xf32, #tpu.memory_space<vmem>>, vector<1x128xf32>
    %485 = vector.broadcast %484 : vector<1x128xf32> to vector<2x128xf32>
    %486 = arith.addf %483, %485 : vector<2x128xf32>
    %487 = tpu.iota {dimensions = array<i32: 1>} : vector<2x128xi32>
    %c2_i32 = arith.constant 2 : i32
    %488 = vector.broadcast %c2_i32 : i32 to vector<2x128xi32>
    %489 = arith.cmpi slt, %487, %488 : vector<2x128xi32>
    %cst_159 = arith.constant -1.000000e+30 : f32
    %490 = vector.broadcast %cst_159 : f32 to vector<2x128xf32>
    %491 = arith.select %489, %486, %490 : vector<2x128xi1>, vector<2x128xf32>
    %cst_160 = arith.constant dense<0xFF800000> : vector<2xf32>
    %492 = vector.multi_reduction <maximumf>, %491, %cst_160 [1] : vector<2x128xf32> to vector<2xf32>
    %493 = vector.shape_cast %492 : vector<2xf32> to vector<2x1xf32>
    %494 = vector.broadcast %493 : vector<2x1xf32> to vector<2x128xf32>
    %495 = arith.subf %491, %494 : vector<2x128xf32>
    %496 = math.exp %495 : vector<2x128xf32>
    %cst_161 = arith.constant dense<0.000000e+00> : vector<2xf32>
    %497 = vector.multi_reduction <add>, %496, %cst_161 [1] : vector<2x128xf32> to vector<2xf32>
    %498 = vector.shape_cast %497 : vector<2xf32> to vector<2x1xf32>
    %499 = math.log %498 : vector<2x1xf32>
    %500 = arith.addf %493, %499 : vector<2x1xf32>
    %c0_162 = arith.constant 0 : index
    %c0_163 = arith.constant 0 : index
    %501 = vector.load %arg4[%c0_162, %c0_163] : memref<2x1xi32, #tpu.memory_space<vmem>>, vector<2x1xi32>
    %502 = vector.broadcast %501 : vector<2x1xi32> to vector<2x128xi32>
    %503 = arith.cmpi eq, %487, %502 : vector<2x128xi32>
    %cst_164 = arith.constant 0.000000e+00 : f32
    %504 = vector.broadcast %cst_164 : f32 to vector<2x128xf32>
    %505 = arith.select %503, %486, %504 : vector<2x128xi1>, vector<2x128xf32>
    %cst_165 = arith.constant dense<0.000000e+00> : vector<2xf32>
    %506 = vector.multi_reduction <add>, %505, %cst_165 [1] : vector<2x128xf32> to vector<2xf32>
    %507 = vector.shape_cast %506 : vector<2xf32> to vector<2x1xf32>
    %508 = arith.subf %500, %507 : vector<2x1xf32>
    %c2_i32_166 = arith.constant 2 : i32
    %509 = vector.broadcast %c2_i32_166 : i32 to vector<2x128xi32>
    %510 = arith.cmpi slt, %487, %509 : vector<2x128xi32>
    %c2_i32_167 = arith.constant 2 : i32
    %511 = vector.broadcast %c2_i32_167 : i32 to vector<2x128xi32>
    %512 = arith.cmpi eq, %487, %511 : vector<2x128xi32>
    %cst_168 = arith.constant 0.000000e+00 : f32
    %513 = vector.shape_cast %508 : vector<2x1xf32> to vector<2x1xf32>
    %514 = vector.broadcast %513 : vector<2x1xf32> to vector<2x128xf32>
    %515 = vector.broadcast %cst_168 : f32 to vector<2x128xf32>
    %516 = arith.select %512, %514, %515 : vector<2x128xi1>, vector<2x128xf32>
    %517 = arith.select %510, %486, %516 : vector<2x128xi1>, vector<2x128xf32>
    %c0_169 = arith.constant 0 : index
    %c0_170 = arith.constant 0 : index
    %518 = vector.load %arg15[%c0_169, %c0_170] : memref<2x128xf32, #tpu.memory_space<vmem>>, vector<2x128xf32>
    tpu.vector_store %arg15[%c0_169, %c0_170], %517 {strides = array<i32>} : memref<2x128xf32, #tpu.memory_space<vmem>>, vector<2x128xf32>,
    return
  }
  func.func @transform_0(%arg0: i32) -> (i32, i32) {
    %c0_i32 = arith.constant 0 : i32
    %c0_i32_0 = arith.constant 0 : i32
    %c0_i32_1 = arith.constant 0 : i32
    return %c0_i32, %c0_i32_0 : i32, i32
  }
  func.func @transform_1(%arg0: i32) -> (i32, i32) {
    %c0_i32 = arith.constant 0 : i32
    %c0_i32_0 = arith.constant 0 : i32
    %c0_i32_1 = arith.constant 0 : i32
    return %c0_i32, %c0_i32_0 : i32, i32
  }
  func.func @transform_2(%arg0: i32) -> (i32, i32) {
    %c0_i32 = arith.constant 0 : i32
    %c0_i32_0 = arith.constant 0 : i32
    %c0_i32_1 = arith.constant 0 : i32
    return %c0_i32, %c0_i32_0 : i32, i32
  }
  func.func @transform_3(%arg0: i32) -> (i32, i32) {
    %c0_i32 = arith.constant 0 : i32
    %c0_i32_0 = arith.constant 0 : i32
    %c0_i32_1 = arith.constant 0 : i32
    return %c0_i32, %c0_i32_0 : i32, i32
  }
  func.func @transform_4(%arg0: i32) -> (i32, i32, i32) {
    %c0_i32 = arith.constant 0 : i32
    %c0_i32_0 = arith.constant 0 : i32
    %c0_i32_1 = arith.constant 0 : i32
    %c0_i32_2 = arith.constant 0 : i32
    return %c0_i32, %c0_i32_0, %c0_i32_1 : i32, i32, i32
  }
  func.func @transform_5(%arg0: i32) -> (i32, i32, i32) {
    %c0_i32 = arith.constant 0 : i32
    %c0_i32_0 = arith.constant 0 : i32
    %c0_i32_1 = arith.constant 0 : i32
    %c0_i32_2 = arith.constant 0 : i32
    return %c0_i32, %c0_i32_0, %c0_i32_1 : i32, i32, i32
  }
  func.func @transform_6(%arg0: i32) -> (i32, i32, i32) {
    %c0_i32 = arith.constant 0 : i32
    %c0_i32_0 = arith.constant 0 : i32
    %c0_i32_1 = arith.constant 0 : i32
    %c0_i32_2 = arith.constant 0 : i32
    return %c0_i32, %c0_i32_0, %c0_i32_1 : i32, i32, i32
  }
  func.func @transform_7(%arg0: i32) -> (i32, i32, i32) {
    %c0_i32 = arith.constant 0 : i32
    %c0_i32_0 = arith.constant 0 : i32
    %c0_i32_1 = arith.constant 0 : i32
    %c0_i32_2 = arith.constant 0 : i32
    return %c0_i32, %c0_i32_0, %c0_i32_1 : i32, i32, i32
  }
  func.func @transform_8(%arg0: i32) -> (i32, i32, i32) {
    %c0_i32 = arith.constant 0 : i32
    %c0_i32_0 = arith.constant 0 : i32
    %c0_i32_1 = arith.constant 0 : i32
    %c0_i32_2 = arith.constant 0 : i32
    return %c0_i32, %c0_i32_0, %c0_i32_1 : i32, i32, i32
  }
  func.func @transform_9(%arg0: i32) -> (i32, i32, i32) {
    %c0_i32 = arith.constant 0 : i32
    %c0_i32_0 = arith.constant 0 : i32
    %c0_i32_1 = arith.constant 0 : i32
    %c0_i32_2 = arith.constant 0 : i32
    return %c0_i32, %c0_i32_0, %c0_i32_1 : i32, i32, i32
  }
  func.func @transform_10(%arg0: i32) -> (i32, i32, i32) {
    %c0_i32 = arith.constant 0 : i32
    %c0_i32_0 = arith.constant 0 : i32
    %c0_i32_1 = arith.constant 0 : i32
    %c0_i32_2 = arith.constant 0 : i32
    return %c0_i32, %c0_i32_0, %c0_i32_1 : i32, i32, i32
  }
  func.func @transform_11(%arg0: i32) -> (i32, i32) {
    %c0_i32 = arith.constant 0 : i32
    %c0_i32_0 = arith.constant 0 : i32
    %c0_i32_1 = arith.constant 0 : i32
    return %c0_i32, %c0_i32_0 : i32, i32
  }
  func.func @transform_12(%arg0: i32) -> (i32, i32) {
    %c0_i32 = arith.constant 0 : i32
    %c0_i32_0 = arith.constant 0 : i32
    %c0_i32_1 = arith.constant 0 : i32
    return %c0_i32, %c0_i32_0 : i32, i32
  }
  func.func @transform_13(%arg0: i32) -> (i32, i32) {
    %c0_i32 = arith.constant 0 : i32
    %c0_i32_0 = arith.constant 0 : i32
    %c0_i32_1 = arith.constant 0 : i32
    return %c0_i32, %c0_i32_0 : i32, i32
  }
  func.func @transform_14(%arg0: i32) -> (i32, i32) {
    %c0_i32 = arith.constant 0 : i32
    %c0_i32_0 = arith.constant 0 : i32
    %c0_i32_1 = arith.constant 0 : i32
    return %c0_i32, %c0_i32_0 : i32, i32
  }
}

</mosaic_0001>

<bundles_post_ra>
// kernel: tile.9
= control target key start
LH: loop header
LB: loop body
LE: loop exit
PB: predicated region body
PF: predicated region fallthrough
CT: control target
= control target key end

     0   :  { %vm3_vm0 = vcmask 261120   ;;  %s34_s0 = inlined_call_operand.vmem [shape: f32[2,5,32], index: 0, kind: input, shape index: {}]   ;;  %s35_s1 = inlined_call_operand.vmem [shape: f32[10,32], index: 1, kind: output, shape index: {}]  }
   0x1   :  { %v2_v0 = vld [vmem:[%s34_s0] sm:$0x1f]   ;;  %v10_v1 = vld [vmem:[%s34_s0 + $0x8] sm:$0x1f]  }
   0x2   :  { %4 = vst.msk [vmem:[%s35_s1] sm:$0x1f] %vm3_vm0, %v2_v0   ;;  %11 = vst.msk [vmem:[%s35_s1 + $0x5] sm:$0x1f] %vm3_vm0, %v10_v1  }

// kernel: vit_classification_forward.1
= control target key start
LH: loop header
LB: loop body
LE: loop exit
PB: predicated region body
PF: predicated region fallthrough
CT: control target
= control target key end

     0   :  { %vm214_vm0 = vcmask 261120   ;;  %vm218_vm1 = vcmask 254976   ;;  %s3818_s18 = smov 96   ;;  %s3820_s19 = smov 64   ;;  %s4622_s1 = inlined_call_operand.vmem [shape: f32[256,32], index: 1, kind: input, shape index: {}]   ;;  %s4623_s0 = inlined_call_operand.vmem [shape: f32[10,256], index: 0, kind: input, shape index: {}]   ;;  %s4624_s2 = inlined_call_operand.vmem [shape: f32[10,32], index: 2, kind: input, shape index: {}]   ;;  %s4625_s4 = inlined_call_operand.vmem [shape: f32[2,32,96], index: 4, kind: input, shape index: {}]   ;;  %s4626_s7 = inlined_call_operand.vmem [shape: f32[2,6,32], index: 7, kind: input, shape index: {}]   ;;  %s4627_s5 = inlined_call_operand.vmem [shape: f32[2,1,96], index: 5, kind: input, shape index: {}]   ;;  %s4628_s6 = inlined_call_operand.vmem [shape: f32[2,32,32], index: 6, kind: input, shape index: {}]   ;;  %s4629_s8 = inlined_call_operand.vmem [shape: f32[2,32,64], index: 8, kind: input, shape index: {}]   ;;  %s4630_s10 = inlined_call_operand.vmem [shape: f32[2,64,32], index: 10, kind: input, shape index: {}]   ;;  %s4631_s9 = inlined_call_operand.vmem [shape: f32[2,1,64], index: 9, kind: input, shape index: {}]   ;;  %s4632_s12 = inlined_call_operand.vmem [shape: f32[32,128], index: 12, kind: input, shape index: {}]   ;;  %s4633_s3 = inlined_call_operand.vmem [shape: s32[2,1], index: 3, kind: input, shape index: {}]   ;;  %s4634_s11 = inlined_call_operand.vmem [shape: f32[2,32], index: 11, kind: input, shape index: {}]   ;;  %s4635_s13 = inlined_call_operand.vmem [shape: f32[1,128], index: 13, kind: input, shape index: {}]   ;;  %s4636_s14 = inlined_call_operand.vmem [shape: f32[2,128], index: 14, kind: output, shape index: {}]  }
   0x1   :  { %v67_v0 = vld [vmem:[%s4622_s1 + $0x80] sm:$0xff]  ;;  %v68_v1 = vld [vmem:[%s4622_s1 + $0x88] sm:$0xff]  ;;  %v69_v5 = vld [vmem:[%s4622_s1 + $0x90] sm:$0xff] }
   0x2   :  { %v51_v2 = vld [vmem:[%s4622_s1] sm:$0xff]  ;;  %v3475_v3 = vpack.c.bf16 %v68_v1, %v67_v0  ;;  %v52_v4 = vld [vmem:[%s4622_s1 + $0x8] sm:$0xff]  ;;  %v70_v6 = vld [vmem:[%s4622_s1 + $0x98] sm:$0xff] }
   0x3   :  { %v3477_v7 = vpack.c.bf16 %v52_v4, %v51_v2  ;;  %v3479_v8 = vpack.c.bf16 %v70_v6, %v69_v5  ;;  %v53_v9 = vld [vmem:[%s4622_s1 + $0x10] sm:$0xff]  ;;  %v54_v10 = vld [vmem:[%s4622_s1 + $0x18] sm:$0xff]  ;;  %v71_v11 = vld [vmem:[%s4622_s1 + $0xa0] sm:$0xff] }
   0x4   :  { %3476 = vmatprep.subr.bf16.mxu0 %v3475_v3  ;;  %v72_v12 = vld [vmem:[%s4622_s1 + $0xa8] sm:$0xff]  ;;  %v3481_v13 = vpack.c.bf16 %v54_v10, %v53_v9  ;;  %v55_v15 = vld [vmem:[%s4622_s1 + $0x20] sm:$0xff]  ;;  %v73_v17 = vld [vmem:[%s4622_s1 + $0xb0] sm:$0xff] }
   0x5   :  { %3478 = vmatpush3.bf16.msra.mxu0 %v3477_v7  ;;  %v3483_v14 = vpack.c.bf16 %v72_v12, %v71_v11  ;;  %v56_v16 = vld [vmem:[%s4622_s1 + $0x28] sm:$0xff]  ;;  %v74_v18 = vld [vmem:[%s4622_s1 + $0xb8] sm:$0xff]  ;;  %v57_v21 = vld [vmem:[%s4622_s1 + $0x30] sm:$0xff] }
   0x6   :  { %3480 = vmatprep.subr.bf16.mxu0 %v3479_v8  ;;  %v3485_v19 = vpack.c.bf16 %v56_v16, %v55_v15  ;;  %v3487_v20 = vpack.c.bf16 %v74_v18, %v73_v17  ;;  %v58_v22 = vld [vmem:[%s4622_s1 + $0x38] sm:$0xff]  ;;  %v75_v23 = vld [vmem:[%s4622_s1 + $0xc0] sm:$0xff]  ;;  %v76_v24 = vld [vmem:[%s4622_s1 + $0xc8] sm:$0xff]  ;;  %v160_v18 = vlaneseq }
   0x7   :  { %v48_v25 = vld [vmem:[%s4623_s0 + $0x8] sm:$0xff]  ;;  %v3489_v26 = vpack.c.bf16 %v58_v22, %v57_v21  ;;  %v3491_v27 = vpack.c.bf16 %v76_v24, %v75_v23  ;;  %v59_v28 = vld [vmem:[%s4622_s1 + $0x40] sm:$0xff]  ;;  %v77_v30 = vld [vmem:[%s4622_s1 + $0xd0] sm:$0xff] }
   0x8   :  { %149 = vmatprep.mubr.f32.mxu0 %v48_v25  ;;  %v60_v29 = vld [vmem:[%s4622_s1 + $0x48] sm:$0xff]  ;;  %v78_v31 = vld [vmem:[%s4622_s1 + $0xd8] sm:$0xff]  ;;  %v61_v34 = vld [vmem:[%s4622_s1 + $0x50] sm:$0xff]  ;;  %v4038_v22 = vshrl.u32 %v160_v18, 7 }
   0x9   :  { %3482 = vmatpush3.bf16.msra.mxu0 %v3481_v13  ;;  %v3493_v32 = vpack.c.bf16 %v60_v29, %v59_v28  ;;  %v3495_v33 = vpack.c.bf16 %v78_v31, %v77_v30  ;;  %v62_v35 = vld [vmem:[%s4622_s1 + $0x58] sm:$0xff]  ;;  %v79_v36 = vld [vmem:[%s4622_s1 + $0xe0] sm:$0xff]  ;;  %v80_v37 = vld [vmem:[%s4622_s1 + $0xe8] sm:$0xff] }
   0xa   :  { %3484 = vmatprep.subr.bf16.mxu0 %v3483_v14  ;;  %v3497_v38 = vpack.c.bf16 %v62_v35, %v61_v34  ;;  %v3499_v39 = vpack.c.bf16 %v80_v37, %v79_v36  ;;  %v63_v40 = vld [vmem:[%s4622_s1 + $0x60] sm:$0xff]  ;;  %v64_v41 = vld [vmem:[%s4622_s1 + $0x68] sm:$0xff]  ;;  %v81_v42 = vld [vmem:[%s4622_s1 + $0xf0] sm:$0xff]  ;;  %v245_v24 = vsub.s32 0, %v4038_v22  ;;  %v4055_v37 = vand.u32 127, %v160_v18 }
   0xb   :  { %v82_v43 = vld [vmem:[%s4622_s1 + $0xf8] sm:$0xff]  ;;  %v3501_v44 = vpack.c.bf16 %v64_v41, %v63_v40  ;;  %v65_v46 = vld [vmem:[%s4622_s1 + $0x70] sm:$0xff]  ;;  %v47_v49 = vld [vmem:[%s4623_s0] sm:$0xff]  ;;  %vm167_vm9 = vcmp.lt.s32.totalorder %v4038_v22, 5  ;;  %vm176_vm11 = vcmp.ge.s32.totalorder %v4038_v22, 5 }
   0xc   :  { %v3503_v45 = vpack.c.bf16 %v82_v43, %v81_v42  ;;  %v66_v47 = vld [vmem:[%s4622_s1 + $0x78] sm:$0xff]  ;;  %v49_v51 = vld [vmem:[%s4623_s0 + $0x10] sm:$0x3]  ;;  %v83_v53 = vld [vmem:[%s4624_s2] sm:$0xff]  ;;  %vm759_vm2 = vcmp.ge.s32.totalorder %v4055_v37, 16  ;;  %vm760_vm3 = vcmp.lt.s32.totalorder %v4055_v37, 24 }
   0xd   :  { %3486 = vmatpush3.bf16.msra.mxu0 %v3485_v19  ;;  %v3505_v48 = vpack.c.bf16 %v66_v47, %v65_v46  ;;  %v50_v50 = vld [vmem:[%s4623_s0 + $0x18] sm:$0x3]  ;;  %v84_v58 = vld [vmem:[%s4624_s2 + $0x8] sm:$0x3]  ;;  %v191_v10 = vld [vmem:[%s4625_s4] sm:$0xff]  ;;  %vm342_vm4 = vcmp.lt.s32.totalorder %v4055_v37, 8 }
   0xe   :  { %3488 = vmatprep.subr.bf16.mxu0 %v3487_v20  ;;  %v192_v11 = vld [vmem:[%s4625_s4 + $0x8] sm:$0xff]  ;;  %v193_v12 = vld [vmem:[%s4625_s4 + $0x10] sm:$0xff]  ;;  %v194_v14 = vld [vmem:[%s4625_s4 + $0x18] sm:$0xff]  ;;  %v3817_v42 = vmov 0.0   ;;  %vm182_vm7 = vcmp.ge.s32.totalorder %v4055_v37, 5  ;;  %vm183_vm8 = vcmp.lt.s32.totalorder %v4055_v37, 10 }
   0xf   :  { %v3507_v13 = vpack.c.bf16 %v192_v11, %v191_v10  ;;  %v3511_v15 = vpack.c.bf16 %v194_v14, %v193_v12  ;;  %v4044_v25 = vld [vmem:[%s4626_s7] sm:$0x3f]  ;;  %vm761_vm5 = vmand %vm759_vm2, %vm760_vm3  ;;  %v4066_v43 = vsel %vm342_vm4, 1.0, %v3817_v42  ;;  %vm172_vm10 = vcmp.lt.s32.totalorder %v4055_v37, 5 }
  0x10   :  { %vm4087_vm6 = vmpackc.low %vm214_vm0, %vm214_vm0  ;;  %vm443_vm4 = vcmask 80896  }
  0x11   :  { %3490 = vmatpush3.bf16.msra.mxu0 %v3489_v26  ;;  %3508 = vmatprep.subr.bf16.mxu1 %v3507_v13  ;;  %v251_v26 = vsub.s32 1, %v4038_v22  ;;  %vm184_vm12 = vmand %vm182_vm7, %vm183_vm8  ;;  %vm478_vm7 = vcmask 1041408   ;;  %vm560_vm8 = vcmp.ge.s32.totalorder %v4055_v37, 8 }
  0x12   :  { %3492 = vmatprep.subr.bf16.mxu0 %v3491_v27  ;;  %3510 = vmatpush3.bf16.msra.mxu1 %v3507_v13  ;;  %v246_v27 = vrot.slane %v4044_v25, %v245_v24  ;;  %vm174_vm13 = vmand %vm167_vm9, %vm172_vm10  ;;  %vm561_vm9 = vcmp.lt.s32.totalorder %v4055_v37, 16  ;;  %vm3821_vm10 = vmmov 1  }
  0x13   :  { %3512 = vmatprep.subr.bf16.mxu1 %v3511_v15  ;;  %v252_v30 = vrot.slane %v4044_v25, %v251_v26  ;;  %vm185_vm14 = vmand %vm176_vm11, %vm184_vm12 }
  0x14   :  { %vm187_vm2 = vmor %vm174_vm13, %vm185_vm14  ;;  %vm958_vm13 = vcmp.ge.s32.totalorder %v4055_v37, 24  ;;  %vm959_vm14 = vcmp.lt.s32.totalorder %v4055_v37, 32 }
  0x15   :  { %3494 = vmatpush3.bf16.msra.mxu0 %v3493_v32  ;;  %vm4136_vm11 = vmpackc.low %vm478_vm7, %vm3821_vm10 }
  0x16   :  { %3496 = vmatprep.subr.bf16.mxu0 %v3495_v33  ;;  %3514 = vmatpush3.bf16.msra.mxu1 %v3511_v15 }
  0x19   :  { %3498 = vmatpush3.bf16.msra.mxu0 %v3497_v38  ;;  %v2965_v38 = vld [vmem:[%s4627_s5] ss:$0 sm:$0xff] }
  0x1a   :  { %3500 = vmatprep.subr.bf16.mxu0 %v3499_v39 }
  0x1d   :  { %3502 = vmatpush3.bf16.msra.mxu0 %v3501_v44  ;;  %v4069_v44 = vsel %vm761_vm5, 1.0, %v3817_v42  ;;  %vm447_vm5 = vcmask 74752  }
  0x1e   :  { %3504 = vmatprep.subr.bf16.mxu0 %v3503_v45 }
  0x21   :  { %3506 = vmatpush3.bf16.msra.mxu0 %v3505_v48 }
  0x24   :  { %150 = vmatmul.mubr.f32.vlgmr.msra.gmra.mrb[0].mxu0 %v47_v49 }
  0x25   :  { %154 = vmatprep.mubr.f32.mxu0 %v50_v50 }
  0x28   :  { %155 = vmatmul.mubr.f32.gmra.mrb[2].mxu0 %v49_v51 }
  0xf7   :  { %v3107_v52 = vpop.f32.mrb[0].mxu0 }
  0xf8   :  { %v3108_v54 = vpop.f32.mrb[1].mxu0 }
  0xf9   :  { %v3109_v55 = vadd.f32 %v3108_v54, %v3107_v52 }
  0xfb   :  { %v4011_v56 = vadd.f32 %v3109_v55, %v83_v53  ;;  %v3110_v57 = vpop.f32.mrb[2].mxu0 }
  0xfc   :  { %v3111_v59 = vpop.f32.mrb[3].mxu0 }
  0xfd   :  { %v3112_v60 = vadd.f32 %v3111_v59, %v3110_v57  ;;  %v215_v61 = vsel %vm214_vm0, %v4011_v56, 0.0  ;;  %v164_v57 = vadd.s32 8, %v4038_v22 }
  0xfe   :  { %216 = vadd.xlane.f32.xlu0 %v215_v61 }
  0xff   :  { %v4018_v62 = vadd.f32 %v3112_v60, %v84_v58  ;;  %vm179_vm15 = vcmp.lt.s32.totalorder %v164_v57, 10 }
 0x100   :  { %vm186_vm3 = vmand %vm179_vm15, %vm184_vm12 }
 0x101   :  { %v219_v63 = vsel %vm218_vm1, %v4018_v62, 0.0  ;;  %vm562_vm12 = vmand %vm560_vm8, %vm561_vm9 }
 0x102   :  { %220 = vadd.xlane.f32.xlu0 %v219_v63  ;;  %v3819_v63 = vmov -1e+30   ;;  %vm960_vm15 = vmand %vm958_vm13, %vm959_vm14 }
 0x18b   :  { %v217_v0 = vpop.xlane.xlu0 %216 }
 0x18c   :  { %v223_v1 = vmul.f32 0.03125, %v217_v0  ;;  %v4121_v0 = vsel %vm187_vm2, 0.0, %v3819_v63  ;;  %vm1387_vm2 = vcmask 523264  }
 0x18e   :  { %v225_v2 = vsub.f32 %v4011_v56, %v223_v1 }
 0x18f   :  { %v221_v3 = vpop.xlane.xlu0 %220 }
 0x190   :  { %v224_v4 = vmul.f32 0.03125, %v221_v3  ;;  %v227_v5 = vmul.f32 %v225_v2, %v225_v2  ;;  %v4123_v3 = vsel %vm186_vm3, 0.0, %v3819_v63 }
 0x192   :  { %v226_v6 = vsub.f32 %v4018_v62, %v224_v4  ;;  %v229_v7 = vsel %vm214_vm0, %v227_v5, 0.0 }
 0x193   :  { %230 = vadd.xlane.f32.xlu1 %v229_v7 }
 0x194   :  { %v228_v8 = vmul.f32 %v226_v6, %v226_v6 }
 0x196   :  { %v232_v9 = vsel %vm218_vm1, %v228_v8, 0.0 }
 0x197   :  { %233 = vadd.xlane.f32.xlu1 %v232_v9 }
 0x220   :  { %v231_v16 = vpop.xlane.xlu1 %230 }
 0x221   :  { %v235_v17 = vmul.f32 0.03125, %v231_v16 }
 0x223   :  { %v237_v19 = vadd.f32 1e-12, %v235_v17 }
 0x224   :  { %v234_v20 = vpop.xlane.xlu1 %233 }
 0x225   :  { %3723 = vrsqrt.f32 %v237_v19  ;;  %v236_v21 = vmul.f32 0.03125, %v234_v20 }
 0x227   :  { %v238_v23 = vadd.f32 1e-12, %v236_v21 }
 0x229   :  { %3725 = vrsqrt.f32 %v238_v23 }
 0x22f   :  { %v3724_v28 = vpop.eup %3723 }
 0x230   :  { %v241_v29 = vmul.f32 %v3724_v28, %v225_v2 }
 0x232   :  { %v247_v31 = vmul.f32 %v246_v27, %v241_v29 }
 0x233   :  { %v3726_v32 = vpop.eup %3725 }
 0x234   :  { %v242_v33 = vmul.f32 %v3726_v32, %v226_v6  ;;  %v253_v34 = vadd.f32 %v252_v30, %v247_v31  ;;  %v4158_v31 = vsel %vm562_vm12, 1.0, %v3817_v42 }
 0x236   :  { %v248_v35 = vmul.f32 %v246_v27, %v242_v33  ;;  %3249 = vmatprep.mubr.msk.f32.mxu1 %vm214_vm0, %v253_v34 }
 0x238   :  { %v254_v36 = vadd.f32 %v252_v30, %v248_v35 }
 0x23a   :  { %3250 = vmatmul.mubr.msk.f32.vlgmr.msra.gmra.mrb[0].mxu1 %vm214_vm0, %v254_v36 }
 0x30d   :  { %v3251_v39 = vpop.f32.mrb[0].mxu1 }
 0x30e   :  { %v4063_v40 = vadd.f32 %v3251_v39, %v2965_v38  ;;  %v333_v41 = vpop.f32.mrb[1].mxu1 }
 0x30f   :  { %v4071_v45 = vadd.f32 %v2965_v38, %v333_v41 }
 0x310   :  { %v347_v54 = vmul.f32 %v4066_v43, %v4063_v40  ;;  %v765_v55 = vmul.f32 %v4069_v44, %v4063_v40  ;;  %v566_v35 = vmul.f32 %v4158_v31, %v4063_v40 }
 0x311   :  { %v4075_v46 = vpack.i.bf16 %v4063_v40, %v4071_v45  ;;  %v346_v47 = vmul.f32 %v4066_v43, %v4071_v45  ;;  %v764_v48 = vmul.f32 %v4069_v44, %v4071_v45  ;;  %v565_v34 = vmul.f32 %v4158_v31, %v4071_v45 }
 0x313   :  { %3702 = vrot.lane.b32.xlu0 %v4075_v46, %s3818_s18  ;;  %3256 = vmatprep.mubr.msk.f32.mxu1 %vm214_vm0, %v346_v47 }
 0x314   :  { %3284 = vmatprep.mubr.msk.f32.mxu0 %vm214_vm0, %v764_v48 }
 0x385   :  { %v3703_v49 = vpop.permute.xlu0 %3702 }
 0x386   :  { %v3705_v50 = vunpack.i.h.bf16 %v3703_v49  ;;  %v3704_v51 = vunpack.i.l.bf16 %v3703_v49 }
 0x388   :  { %v4091_v53 = vpack.c.bf16 %v3705_v50, %v3704_v51 }
 0x38a   :  { %3517 = vmatprep.subr.msk.bf16.mxu1 %vm4087_vm6, %v4091_v53  ;;  %3541 = vmatprep.subr.msk.bf16.mxu0 %vm4087_vm6, %v4091_v53 }
 0x38b   :  { %3520 = vmatpush3.bf16.xpose.msk.msra.mxu1 %vm4087_vm6, %v4091_v53  ;;  %3544 = vmatpush3.bf16.xpose.msk.msra.mxu0 %vm4087_vm6, %v4091_v53 }
 0x392   :  { %3257 = vmatmul.mubr.msk.f32.vlgmr.msra.gmra.mrb[2].mxu1 %vm214_vm0, %v347_v54  ;;  %3285 = vmatmul.mubr.msk.f32.vlgmr.msra.gmra.mrb[4].mxu0 %vm214_vm0, %v765_v55 }
 0x465   :  { %v3258_v58 = vpop.f32.mrb[2].mxu1  ;;  %v4117_v59 = vpop.f32.mrb[4].mxu0 }
 0x466   :  { %v430_v60 = vpop.f32.mrb[3].mxu1  ;;  %v4119_v61 = vpop.f32.mrb[5].mxu0  ;;  %v440_v1 = vmul.f32 0.35355338, %v3258_v58  ;;  %v848_v54 = vmul.f32 0.35355338, %v4117_v59 }
 0x467   :  { %v439_v2 = vmul.f32 0.35355338, %v430_v60  ;;  %v847_v47 = vmul.f32 0.35355338, %v4119_v61 }
 0x468   :  { %v442_v6 = vadd.f32 %v440_v1, %v4123_v3  ;;  %v850_v60 = vadd.f32 %v848_v54, %v4123_v3 }
 0x469   :  { %v441_v4 = vadd.f32 %v439_v2, %v4121_v0  ;;  %v849_v57 = vadd.f32 %v847_v47, %v4121_v0 }
 0x46a   :  { %v448_v7 = vsel %vm447_vm5, %v442_v6, -inf  ;;  %v854_v61 = vsel %vm447_vm5, %v850_v60, -inf }
 0x46b   :  { %v444_v5 = vsel %vm443_vm4, %v441_v4, -inf  ;;  %v851_v58 = vsel %vm443_vm4, %v849_v57, -inf }
 0x46c   :  { %445 = vmax.xlane.f32.xlu1 %v444_v5 }
 0x470   :  { %449 = vmax.xlane.f32.xlu1 %v448_v7 }
 0x4f9   :  { %v446_v8 = vpop.xlane.xlu1 %445 }
 0x4fa   :  { %v451_v9 = vsub.f32 %v441_v4, %v446_v8 }
 0x4fc   :  { %v453_v12 = vmul.f32 1.442695, %v451_v9 }
 0x4fd   :  { %v450_v10 = vpop.xlane.xlu1 %449 }
 0x4fe   :  { %v452_v11 = vsub.f32 %v442_v6, %v450_v10 }
 0x500   :  { %v455_v13 = vmul.f32 1.442695, %v452_v11 }
 0x502   :  { %3727 = vpow2.f32 %v455_v13 }
 0x503   :  { %3729 = vpow2.f32 %v453_v12 }
 0x50c   :  { %v3728_v14 = vpop.eup %3727 }
 0x50d   :  { %v460_v15 = vsel %vm447_vm5, %v3728_v14, 0.0  ;;  %v3730_v16 = vpop.eup %3729 }
 0x50e   :  { %461 = vadd.xlane.f32.xlu1 %v460_v15  ;;  %v457_v17 = vsel %vm443_vm4, %v3730_v16, 0.0 }
 0x512   :  { %458 = vadd.xlane.f32.xlu1 %v457_v17 }
 0x523   :  { %3707 = vrot.lane.b32.xlu1 %v4075_v46, %s3820_s19 }
 0x59b   :  { %v462_v18 = vpop.xlane.xlu1 %461 }
 0x59c   :  { %3731 = vrcp.f32 %v462_v18 }
 0x59f   :  { %v459_v19 = vpop.xlane.xlu1 %458 }
 0x5a0   :  { %3733 = vrcp.f32 %v459_v19 }
 0x5a3   :  { %v3708_v20 = vpop.permute.xlu1 %3707 }
 0x5a4   :  { %v3710_v21 = vunpack.i.h.bf16 %v3708_v20  ;;  %v3709_v23 = vunpack.i.l.bf16 %v3708_v20 }
 0x5a6   :  { %v4140_v28 = vpack.c.bf16 %v3710_v21, %v3709_v23  ;;  %v3732_v29 = vpop.eup %3731 }
 0x5a7   :  { %v466_v33 = vmul.f32 %v3732_v29, %v3728_v14 }
 0x5a8   :  { %3523 = vmatprep.subr.msk.bf16.mxu1 %vm4136_vm11, %v4140_v28  ;;  %3559 = vmatprep.subr.msk.bf16.mxu0 %vm4136_vm11, %v4140_v28 }
 0x5a9   :  { %3526 = vmatpush3.bf16.msk.msra.mxu1 %vm4136_vm11, %v4140_v28  ;;  %3562 = vmatpush3.bf16.msk.msra.mxu0 %vm4136_vm11, %v4140_v28 }
 0x5aa   :  { %v3734_v30 = vpop.eup %3733  ;;  %3529 = vmatprep.subr.msk.bf16.mxu1 %vm4087_vm6, %v4091_v53 }
 0x5ab   :  { %v465_v32 = vmul.f32 %v3734_v30, %v3730_v16 }
 0x5ad   :  { %3263 = vmatprep.mubr.msk.f32.mxu1 %vm443_vm4, %v465_v32 }
 0x5ae   :  { %3264 = vmatmul.mubr.msk.f32.vlgmr.msra.gmra.mrb[4].mxu1 %vm443_vm4, %v466_v33 }
 0x5af   :  { %3270 = vmatprep.mubr.msk.f32.mxu1 %vm214_vm0, %v565_v34 }
 0x5b2   :  { %3532 = vmatpush3.bf16.xpose.msk.msra.mxu1 %vm4087_vm6, %v4091_v53 }
 0x5b3   :  { %3535 = vmatprep.subr.msk.bf16.mxu1 %vm4136_vm11, %v4140_v28 }
 0x5b9   :  { %3271 = vmatmul.mubr.msk.f32.vlgmr.msra.gmra.mrb[6].mxu1 %vm214_vm0, %v566_v35 }
 0x5ba   :  { %3538 = vmatpush3.bf16.msk.msra.mxu1 %vm4136_vm11, %v4140_v28 }
 0x5bb   :  { %3547 = vmatprep.subr.msk.bf16.mxu1 %vm4136_vm11, %v4140_v28 }
 0x681   :  { %v4180_v36 = vpop.f32.mrb[4].mxu1 }
 0x682   :  { %v4182_v38 = vpop.f32.mrb[5].mxu1 }
 0x683   :  { %v556_v54 = vmul.f32 %v4066_v43, %v4182_v38 }
 0x68c   :  { %v3272_v39 = vpop.f32.mrb[6].mxu1 }
 0x68d   :  { %v649_v41 = vmul.f32 0.35355338, %v3272_v39  ;;  %v639_v46 = vpop.f32.mrb[7].mxu1 }
 0x68e   :  { %v648_v48 = vmul.f32 0.35355338, %v639_v46  ;;  %v4209_v46 = vsel %vm960_vm15, 1.0, %v3817_v42 }
 0x68f   :  { %v651_v49 = vadd.f32 %v649_v41, %v4123_v3 }
 0x690   :  { %v650_v50 = vadd.f32 %v648_v48, %v4121_v0  ;;  %v963_v48 = vmul.f32 %v4209_v46, %v4071_v45 }
 0x691   :  { %v655_v51 = vsel %vm447_vm5, %v651_v49, -inf }
 0x692   :  { %656 = vmax.xlane.f32.xlu1 %v655_v51  ;;  %v652_v55 = vsel %vm443_vm4, %v650_v50, -inf }
 0x693   :  { %653 = vmax.xlane.f32.xlu0 %v652_v55 }
 0x697   :  { %852 = vmax.xlane.f32.xlu0 %v851_v58 }
 0x69b   :  { %855 = vmax.xlane.f32.xlu0 %v854_v61 }
 0x71f   :  { %v657_v63 = vpop.xlane.xlu1 %656 }
 0x720   :  { %v659_v1 = vsub.f32 %v651_v49, %v657_v63  ;;  %v654_v2 = vpop.xlane.xlu0 %653 }
 0x721   :  { %v658_v4 = vsub.f32 %v650_v50, %v654_v2  ;;  %v557_v50 = vmul.f32 %v4180_v36, %v4066_v43 }
 0x722   :  { %v662_v5 = vmul.f32 1.442695, %v659_v1 }
 0x723   :  { %v660_v59 = vmul.f32 1.442695, %v658_v4 }
 0x724   :  { %v853_v6 = vpop.xlane.xlu0 %852 }
 0x725   :  { %3735 = vpow2.f32 %v660_v59  ;;  %v857_v7 = vsub.f32 %v849_v57, %v853_v6 }
 0x726   :  { %3737 = vpow2.f32 %v662_v5 }
 0x727   :  { %v859_v8 = vmul.f32 1.442695, %v857_v7 }
 0x728   :  { %v856_v9 = vpop.xlane.xlu0 %855 }
 0x729   :  { %v858_v10 = vsub.f32 %v850_v60, %v856_v9  ;;  %3739 = vpow2.f32 %v859_v8 }
 0x72b   :  { %v861_v11 = vmul.f32 1.442695, %v858_v10 }
 0x72d   :  { %3741 = vpow2.f32 %v861_v11 }
 0x72f   :  { %v3736_v12 = vpop.eup %3735 }
 0x730   :  { %v664_v13 = vsel %vm443_vm4, %v3736_v12, 0.0  ;;  %v3738_v14 = vpop.eup %3737 }
 0x731   :  { %665 = vadd.xlane.f32.xlu0 %v664_v13  ;;  %v667_v15 = vsel %vm447_vm5, %v3738_v14, 0.0 }
 0x733   :  { %v3740_v16 = vpop.eup %3739 }
 0x734   :  { %v863_v18 = vsel %vm443_vm4, %v3740_v16, 0.0 }
 0x735   :  { %668 = vadd.xlane.f32.xlu0 %v667_v15 }
 0x737   :  { %v3742_v17 = vpop.eup %3741 }
 0x738   :  { %v866_v19 = vsel %vm447_vm5, %v3742_v17, 0.0 }
 0x739   :  { %864 = vadd.xlane.f32.xlu0 %v863_v18  ;;  %867 = vadd.xlane.f32.xlu1 %v866_v19  ;;  %v196_v18 = vld [vmem:[%s4628_s6] sm:$0xff]  ;;  %v197_v19 = vld [vmem:[%s4628_s6 + $0x8] sm:$0xff] }
 0x7be   :  { %v666_v20 = vpop.xlane.xlu0 %665 }
 0x7bf   :  { %3743 = vrcp.f32 %v666_v20  ;;  %v3563_v20 = vpack.c.bf16 %v197_v19, %v196_v18  ;;  %v1272_v18 = vsub.s32 2, %v4038_v22  ;;  %v1278_v19 = vsub.s32 3, %v4038_v22 }
 0x7c1   :  { %3564 = vmatprep.subr.bf16.mxu0 %v3563_v20 }
 0x7c2   :  { %v669_v21 = vpop.xlane.xlu0 %668 }
 0x7c3   :  { %3745 = vrcp.f32 %v669_v21 }
 0x7c6   :  { %v868_v23 = vpop.xlane.xlu1 %867  ;;  %v865_v29 = vpop.xlane.xlu0 %864 }
 0x7c7   :  { %3747 = vrcp.f32 %v868_v23 }
 0x7c8   :  { %3749 = vrcp.f32 %v865_v29 }
 0x7c9   :  { %v3744_v30 = vpop.eup %3743 }
 0x7ca   :  { %v672_v32 = vmul.f32 %v3744_v30, %v3736_v12 }
 0x7cc   :  { %3277 = vmatprep.mubr.msk.f32.mxu1 %vm443_vm4, %v672_v32 }
 0x7cd   :  { %v3746_v33 = vpop.eup %3745 }
 0x7ce   :  { %v673_v34 = vmul.f32 %v3746_v33, %v3738_v14 }
 0x7d0   :  { %3278 = vmatmul.mubr.msk.f32.vlgmr.msra.gmra.mrb[8].mxu1 %vm443_vm4, %v673_v34  ;;  %v198_v34 = vld [vmem:[%s4628_s6 + $0x10] sm:$0xff] }
 0x7d1   :  { %v3748_v35 = vpop.eup %3747  ;;  %3550 = vmatpush3.bf16.msk.msra.mxu1 %vm4136_vm11, %v4140_v28  ;;  %v964_v28 = vmul.f32 %v4209_v46, %v4063_v40 }
 0x7d2   :  { %v3750_v39 = vpop.eup %3749  ;;  %v872_v41 = vmul.f32 %v3748_v35, %v3742_v17  ;;  %3553 = vmatprep.subr.msk.bf16.mxu1 %vm4087_vm6, %v4091_v53  ;;  %v199_v35 = vld [vmem:[%s4628_s6 + $0x18] sm:$0xff] }
 0x7d3   :  { %v871_v47 = vmul.f32 %v3750_v39, %v3740_v16  ;;  %v3567_v39 = vpack.c.bf16 %v199_v35, %v198_v34 }
 0x7d5   :  { %3291 = vmatprep.mubr.msk.f32.mxu1 %vm443_vm4, %v871_v47 }
 0x7d6   :  { %3292 = vmatmul.mubr.msk.f32.vlgmr.msra.gmra.mrb[10].mxu1 %vm443_vm4, %v872_v41 }
 0x7d7   :  { %3298 = vmatprep.mubr.msk.f32.mxu1 %vm214_vm0, %v963_v48 }
 0x7da   :  { %3556 = vmatpush3.bf16.xpose.msk.msra.mxu1 %vm4087_vm6, %v4091_v53 }
 0x7e1   :  { %3299 = vmatmul.mubr.msk.f32.vlgmr.msra.gmra.mrb[12].mxu1 %vm214_vm0, %v964_v28 }
 0x8a3   :  { %v3279_v49 = vpop.f32.mrb[8].mxu1 }
 0x8a4   :  { %v756_v51 = vmul.f32 %v3279_v49, %v4158_v31  ;;  %v746_v45 = vpop.f32.mrb[9].mxu1 }
 0x8a5   :  { %v755_v55 = vmul.f32 %v4158_v31, %v746_v45 }
 0x8a6   :  { %v758_v57 = vadd.f32 %v756_v51, %v557_v50  ;;  %v1159_v51 = vsub.s32 4, %v4038_v22 }
 0x8a7   :  { %v757_v58 = vadd.f32 %v755_v55, %v556_v54 }
 0x8a8   :  { %v1160_v45 = vrot.slane %v4044_v25, %v1159_v51 }
 0x8a9   :  { %v3293_v53 = vpop.f32.mrb[10].mxu1 }
 0x8aa   :  { %v955_v60 = vmul.f32 %v3293_v53, %v4069_v44  ;;  %v945_v40 = vpop.f32.mrb[11].mxu1 }
 0x8ab   :  { %v954_v61 = vmul.f32 %v4069_v44, %v945_v40 }
 0x8ac   :  { %v957_v63 = vadd.f32 %v955_v60, %v758_v57 }
 0x8ad   :  { %v956_v1 = vadd.f32 %v954_v61, %v757_v58 }
 0x8b4   :  { %v3300_v2 = vpop.f32.mrb[12].mxu1 }
 0x8b5   :  { %v1047_v36 = vmul.f32 0.35355338, %v3300_v2  ;;  %v1037_v4 = vpop.f32.mrb[13].mxu1 }
 0x8b6   :  { %v1046_v5 = vmul.f32 0.35355338, %v1037_v4 }
 0x8b7   :  { %v1049_v59 = vadd.f32 %v1047_v36, %v4123_v3 }
 0x8b8   :  { %v1048_v38 = vadd.f32 %v1046_v5, %v4121_v0 }
 0x8b9   :  { %v1053_v6 = vsel %vm447_vm5, %v1049_v59, -inf }
 0x8ba   :  { %1054 = vmax.xlane.f32.xlu1 %v1053_v6  ;;  %v1050_v7 = vsel %vm443_vm4, %v1048_v38, -inf  ;;  %v201_v6 = vld [vmem:[%s4629_s8] sm:$0xff] }
 0x8bb   :  { %1051 = vmax.xlane.f32.xlu0 %v1050_v7  ;;  %v202_v7 = vld [vmem:[%s4629_s8 + $0x8] sm:$0xff] }
 0x947   :  { %v1055_v8 = vpop.xlane.xlu1 %1054 }
 0x948   :  { %v1057_v9 = vsub.f32 %v1049_v59, %v1055_v8  ;;  %v1052_v10 = vpop.xlane.xlu0 %1051  ;;  %v3571_v8 = vpack.c.bf16 %v202_v7, %v201_v6 }
 0x949   :  { %v1056_v11 = vsub.f32 %v1048_v38, %v1052_v10  ;;  %v204_v10 = vld [vmem:[%s4629_s8 + $0x18] sm:$0xff] }
 0x94a   :  { %v1060_v12 = vmul.f32 1.442695, %v1057_v9  ;;  %3572 = vmatprep.subr.bf16.mxu1 %v3571_v8  ;;  %v203_v9 = vld [vmem:[%s4629_s8 + $0x10] sm:$0xff] }
 0x94b   :  { %v1058_v13 = vmul.f32 1.442695, %v1056_v11  ;;  %3574 = vmatpush3.bf16.msra.mxu1 %v3571_v8  ;;  %v3575_v11 = vpack.c.bf16 %v204_v10, %v203_v9 }
 0x94c   :  { %3751 = vpow2.f32 %v1060_v12 }
 0x94d   :  { %3753 = vpow2.f32 %v1058_v13  ;;  %3576 = vmatprep.subr.bf16.mxu1 %v3575_v11 }
 0x94f   :  { %3578 = vmatpush3.bf16.msra.mxu1 %v3575_v11 }
 0x956   :  { %v3752_v14 = vpop.eup %3751 }
 0x957   :  { %v3754_v15 = vpop.eup %3753  ;;  %v1065_v16 = vsel %vm447_vm5, %v3752_v14, 0.0 }
 0x958   :  { %1066 = vadd.xlane.f32.xlu1 %v1065_v16  ;;  %v1062_v17 = vsel %vm443_vm4, %v3754_v15, 0.0 }
 0x959   :  { %1063 = vadd.xlane.f32.xlu0 %v1062_v17 }
 0x9e5   :  { %v1067_v21 = vpop.xlane.xlu1 %1066 }
 0x9e6   :  { %3755 = vrcp.f32 %v1067_v21  ;;  %v1064_v23 = vpop.xlane.xlu0 %1063 }
 0x9e7   :  { %3757 = vrcp.f32 %v1064_v23 }
 0x9f0   :  { %v3756_v29 = vpop.eup %3755 }
 0x9f1   :  { %v3758_v30 = vpop.eup %3757  ;;  %v1071_v33 = vmul.f32 %v3756_v29, %v3752_v14 }
 0x9f2   :  { %v1070_v32 = vmul.f32 %v3758_v30, %v3754_v15 }
 0x9f4   :  { %3305 = vmatprep.mubr.msk.f32.mxu0 %vm443_vm4, %v1070_v32  ;;  %v1279_v32 = vrot.slane %v4044_v25, %v1278_v19 }
 0x9f5   :  { %3306 = vmatmul.mubr.msk.f32.vlgmr.msra.gmra.mrb[6].mxu0 %vm443_vm4, %v1071_v33 }
 0x9f6   :  { %3566 = vmatpush3.bf16.msra.mxu0 %v3563_v20  ;;  %v1273_v20 = vrot.slane %v4044_v25, %v1272_v18 }
 0x9f7   :  { %3568 = vmatprep.subr.bf16.mxu0 %v3567_v39 }
 0x9fa   :  { %3570 = vmatpush3.bf16.msra.mxu0 %v3567_v39 }
 0xac8   :  { %v3307_v41 = vpop.f32.mrb[6].mxu0 }
 0xac9   :  { %v1154_v47 = vmul.f32 %v3307_v41, %v4209_v46  ;;  %v1144_v48 = vpop.f32.mrb[7].mxu0  ;;  %v206_v41 = vld [vmem:[%s4630_s10] sm:$0xff] }
 0xaca   :  { %v1153_v28 = vmul.f32 %v4209_v46, %v1144_v48 }
 0xacb   :  { %v1156_v49 = vadd.f32 %v1154_v47, %v957_v63  ;;  %v207_v47 = vld [vmem:[%s4630_s10 + $0x8] sm:$0xff] }
 0xacc   :  { %v1155_v50 = vadd.f32 %v1153_v28, %v956_v1  ;;  %v3579_v48 = vpack.c.bf16 %v207_v47, %v206_v41  ;;  %v208_v28 = vld [vmem:[%s4630_s10 + $0x10] sm:$0xff] }
 0xace   :  { %3316 = vmatprep.mubr.msk.f32.mxu0 %vm214_vm0, %v1155_v50  ;;  %v210_v50 = vld [vmem:[%s4630_s10 + $0x20] sm:$0xff]  ;;  %3580 = vmatprep.subr.bf16.mxu0 %v3579_v48 }
 0xacf   :  { %3317 = vmatmul.mubr.msk.f32.vlgmr.msra.gmra.mrb[8].mxu0 %vm214_vm0, %v1156_v49  ;;  %v209_v49 = vld [vmem:[%s4630_s10 + $0x18] sm:$0xff] }
 0xad0   :  { %3582 = vmatpush3.bf16.msra.mxu0 %v3579_v48 }
 0xba2   :  { %v3318_v54 = vpop.f32.mrb[8].mxu0 }
 0xba3   :  { %v1239_v55 = vadd.f32 %v3318_v54, %v1160_v45  ;;  %v1233_v57 = vpop.f32.mrb[9].mxu0  ;;  %v211_v54 = vld [vmem:[%s4630_s10 + $0x28] sm:$0xff] }
 0xba4   :  { %v1234_v58 = vadd.f32 %v1233_v57, %v1160_v45  ;;  %v3583_v45 = vpack.c.bf16 %v209_v49, %v208_v28  ;;  %v212_v57 = vld [vmem:[%s4630_s10 + $0x30] sm:$0xff] }
 0xba5   :  { %v4259_v53 = vadd.f32 %v1239_v55, %v4018_v62  ;;  %v3587_v55 = vpack.c.bf16 %v211_v54, %v210_v50  ;;  %v3007_v54 = vld [vmem:[%s4625_s4 + $0x20] sm:$0xff] }
 0xba6   :  { %v4262_v60 = vadd.f32 %v1234_v58, %v4011_v56  ;;  %3584 = vmatprep.subr.bf16.mxu0 %v3583_v45  ;;  %v213_v58 = vld [vmem:[%s4630_s10 + $0x38] sm:$0xff] }
 0xba7   :  { %v1247_v40 = vsel %vm218_vm1, %v4259_v53, 0.0  ;;  %3586 = vmatpush3.bf16.msra.mxu0 %v3583_v45 }
 0xba8   :  { %1248 = vadd.xlane.f32.xlu1 %v1247_v40  ;;  %v1244_v61 = vsel %vm214_vm0, %v4262_v60, 0.0  ;;  %3588 = vmatprep.subr.bf16.mxu0 %v3587_v55  ;;  %v3591_v40 = vpack.c.bf16 %v213_v58, %v212_v57  ;;  %v3009_v58 = vld [vmem:[%s4625_s4 + $0x30] sm:$0xff] }
 0xba9   :  { %1245 = vadd.xlane.f32.xlu0 %v1244_v61  ;;  %v3002_v61 = vld [vmem:[%s4631_s9] ss:$0 sm:$0xff] }
 0xbab   :  { %3590 = vmatpush3.bf16.msra.mxu0 %v3587_v55  ;;  %v3008_v55 = vld [vmem:[%s4625_s4 + $0x28] sm:$0xff] }
 0xbac   :  { %3592 = vmatprep.subr.bf16.mxu0 %v3591_v40  ;;  %v3595_v57 = vpack.c.bf16 %v3008_v55, %v3007_v54 }
 0xbae   :  { %3596 = vmatprep.subr.bf16.mxu1 %v3595_v57 }
 0xbaf   :  { %3594 = vmatpush3.bf16.msra.mxu0 %v3591_v40  ;;  %v3010_v40 = vld [vmem:[%s4625_s4 + $0x38] sm:$0xff] }
 0xc35   :  { %v1249_v63 = vpop.xlane.xlu1 %1248 }
 0xc36   :  { %v1251_v1 = vmul.f32 0.03125, %v1249_v63  ;;  %v1246_v2 = vpop.xlane.xlu0 %1245 }
 0xc37   :  { %v1250_v36 = vmul.f32 0.03125, %v1246_v2 }
 0xc38   :  { %v1253_v4 = vsub.f32 %v4259_v53, %v1251_v1 }
 0xc39   :  { %v1252_v62 = vsub.f32 %v4262_v60, %v1250_v36 }
 0xc3a   :  { %v1255_v5 = vmul.f32 %v1253_v4, %v1253_v4 }
 0xc3b   :  { %v1254_v59 = vmul.f32 %v1252_v62, %v1252_v62 }
 0xc3c   :  { %v1259_v56 = vsel %vm218_vm1, %v1255_v5, 0.0 }
 0xc3d   :  { %1260 = vadd.xlane.f32.xlu1 %v1259_v56  ;;  %v1256_v38 = vsel %vm214_vm0, %v1254_v59, 0.0 }
 0xc3e   :  { %1257 = vadd.xlane.f32.xlu0 %v1256_v38 }
 0xcca   :  { %v1261_v12 = vpop.xlane.xlu1 %1260 }
 0xccb   :  { %v1263_v13 = vmul.f32 0.03125, %v1261_v12  ;;  %v1258_v14 = vpop.xlane.xlu0 %1257 }
 0xccc   :  { %v1262_v15 = vmul.f32 0.03125, %v1258_v14 }
 0xccd   :  { %v1265_v16 = vadd.f32 1e-12, %v1263_v13 }
 0xcce   :  { %v1264_v17 = vadd.f32 1e-12, %v1262_v15 }
 0xccf   :  { %3759 = vrsqrt.f32 %v1265_v16 }
 0xcd0   :  { %3761 = vrsqrt.f32 %v1264_v17 }
 0xcd9   :  { %v3760_v21 = vpop.eup %3759 }
 0xcda   :  { %v3762_v23 = vpop.eup %3761  ;;  %v1269_v29 = vmul.f32 %v3760_v21, %v1253_v4 }
 0xcdb   :  { %v1268_v30 = vmul.f32 %v3762_v23, %v1252_v62 }
 0xcdc   :  { %v1275_v33 = vmul.f32 %v1273_v20, %v1269_v29 }
 0xcdd   :  { %v1274_v34 = vmul.f32 %v1273_v20, %v1268_v30  ;;  %v1473_v20 = vsub.s32 5, %v4038_v22 }
 0xcde   :  { %v1281_v39 = vadd.f32 %v1279_v32, %v1275_v33 }
 0xcdf   :  { %v1280_v35 = vadd.f32 %v1279_v32, %v1274_v34  ;;  %v1474_v21 = vrot.slane %v4044_v25, %v1473_v20 }
 0xce1   :  { %3327 = vmatprep.mubr.msk.f32.mxu1 %vm214_vm0, %v1280_v35 }
 0xce2   :  { %3328 = vmatmul.mubr.msk.f32.vlgmr.msra.gmra.mrb[14].mxu1 %vm214_vm0, %v1281_v39 }
 0xce3   :  { %3598 = vmatpush3.bf16.msra.mxu1 %v3595_v57 }
 0xdb5   :  { %v3329_v63 = vpop.f32.mrb[14].mxu1 }
 0xdb6   :  { %v1366_v1 = vadd.f32 %v3329_v63, %v3002_v61  ;;  %v1360_v2 = vpop.f32.mrb[15].mxu1 }
 0xdb7   :  { %v1361_v36 = vadd.f32 %v3002_v61, %v1360_v2  ;;  %v3599_v61 = vpack.c.bf16 %v3010_v40, %v3009_v58 }
 0xdb8   :  { %v1372_v4 = vmul.f32 0.044715, %v1366_v1  ;;  %v1370_v15 = vmul.f32 0.5, %v1366_v1 }
 0xdb9   :  { %v1371_v62 = vmul.f32 0.044715, %v1361_v36  ;;  %v1369_v13 = vmul.f32 0.5, %v1361_v36  ;;  %3600 = vmatprep.subr.bf16.mxu1 %v3599_v61 }
 0xdba   :  { %v1374_v5 = vmul.f32 %v1372_v4, %v1366_v1  ;;  %3602 = vmatpush3.bf16.msra.mxu1 %v3599_v61 }
 0xdbb   :  { %v1373_v59 = vmul.f32 %v1371_v62, %v1361_v36 }
 0xdbc   :  { %v1376_v56 = vmul.f32 %v1374_v5, %v1366_v1  ;;  %v4356_v5 = vld [vmem:[%s4626_s7 + $0x8] sm:$0x3f] }
 0xdbd   :  { %v1375_v38 = vmul.f32 %v1373_v59, %v1361_v36  ;;  %v1536_v59 = vrot.slane %v4356_v5, %v245_v24  ;;  %v3030_v24 = vld [vmem:[%s4627_s5 + $0x1] ss:$0 sm:$0xff] }
 0xdbe   :  { %v1378_v6 = vadd.f32 %v1376_v56, %v1366_v1 }
 0xdbf   :  { %v1377_v7 = vadd.f32 %v1375_v38, %v1361_v36 }
 0xdc0   :  { %v1380_v8 = vmul.f32 0.7978846, %v1378_v6  ;;  %v1542_v6 = vrot.slane %v4356_v5, %v251_v26 }
 0xdc1   :  { %v1379_v9 = vmul.f32 0.7978846, %v1377_v7 }
 0xdc2   :  { %3763 = vtanh.f32 %v1380_v8 }
 0xdc3   :  { %3765 = vtanh.f32 %v1379_v9 }
 0xdcc   :  { %v3764_v10 = vpop.eup %3763 }
 0xdcd   :  { %v3766_v11 = vpop.eup %3765  ;;  %v1384_v12 = vadd.f32 1.0, %v3764_v10 }
 0xdce   :  { %v1383_v14 = vadd.f32 1.0, %v3766_v11 }
 0xdcf   :  { %v1386_v17 = vmul.f32 %v1384_v12, %v1370_v15 }
 0xdd0   :  { %v1385_v16 = vmul.f32 %v1383_v14, %v1369_v13 }
 0xdd2   :  { %3346 = vmatprep.mubr.msk.f32.mxu0 %vm1387_vm2, %v1385_v16 }
 0xdd3   :  { %3347 = vmatmul.mubr.msk.f32.vlgmr.msra.gmra.mrb[10].mxu0 %vm1387_vm2, %v1386_v17 }
 0xea6   :  { %v3348_v23 = vpop.f32.mrb[10].mxu0 }
 0xea7   :  { %v1470_v29 = vadd.f32 %v3348_v23, %v4259_v53  ;;  %v1460_v30 = vpop.f32.mrb[11].mxu0 }
 0xea8   :  { %v1469_v32 = vadd.f32 %v1460_v30, %v4262_v60 }
 0xea9   :  { %v4329_v33 = vadd.f32 %v1474_v21, %v1470_v29 }
 0xeaa   :  { %v4331_v34 = vadd.f32 %v1474_v21, %v1469_v32 }
 0xeab   :  { %v1510_v35 = vsel %vm218_vm1, %v4329_v33, 0.0 }
 0xeac   :  { %1511 = vadd.xlane.f32.xlu1 %v1510_v35  ;;  %v1507_v39 = vsel %vm214_vm0, %v4331_v34, 0.0 }
 0xead   :  { %1508 = vadd.xlane.f32.xlu0 %v1507_v39 }
 0xf39   :  { %v1512_v41 = vpop.xlane.xlu1 %1511 }
 0xf3a   :  { %v1514_v25 = vmul.f32 0.03125, %v1512_v41  ;;  %v1509_v47 = vpop.xlane.xlu0 %1508 }
 0xf3b   :  { %v1513_v48 = vmul.f32 0.03125, %v1509_v47 }
 0xf3c   :  { %v1516_v53 = vsub.f32 %v4329_v33, %v1514_v25 }
 0xf3d   :  { %v1515_v60 = vsub.f32 %v4331_v34, %v1513_v48 }
 0xf3e   :  { %v1518_v28 = vmul.f32 %v1516_v53, %v1516_v53 }
 0xf3f   :  { %v1517_v49 = vmul.f32 %v1515_v60, %v1515_v60 }
 0xf40   :  { %v1522_v50 = vsel %vm218_vm1, %v1518_v28, 0.0 }
 0xf41   :  { %1523 = vadd.xlane.f32.xlu1 %v1522_v50  ;;  %v1519_v45 = vsel %vm214_vm0, %v1517_v49, 0.0 }
 0xf42   :  { %1520 = vadd.xlane.f32.xlu0 %v1519_v45 }
 0xfce   :  { %v1524_v63 = vpop.xlane.xlu1 %1523 }
 0xfcf   :  { %v1526_v1 = vmul.f32 0.03125, %v1524_v63  ;;  %v1521_v2 = vpop.xlane.xlu0 %1520 }
 0xfd0   :  { %v1525_v36 = vmul.f32 0.03125, %v1521_v2 }
 0xfd1   :  { %v1528_v4 = vadd.f32 1e-12, %v1526_v1 }
 0xfd2   :  { %v1527_v62 = vadd.f32 1e-12, %v1525_v36 }
 0xfd3   :  { %3767 = vrsqrt.f32 %v1528_v4 }
 0xfd4   :  { %3769 = vrsqrt.f32 %v1527_v62 }
 0xfdd   :  { %v3768_v56 = vpop.eup %3767 }
 0xfde   :  { %v3770_v38 = vpop.eup %3769  ;;  %v1532_v7 = vmul.f32 %v3768_v56, %v1516_v53 }
 0xfdf   :  { %v1531_v8 = vmul.f32 %v3770_v38, %v1515_v60 }
 0xfe0   :  { %v1538_v9 = vmul.f32 %v1536_v59, %v1532_v7 }
 0xfe1   :  { %v1537_v10 = vmul.f32 %v1536_v59, %v1531_v8 }
 0xfe2   :  { %v1544_v11 = vadd.f32 %v1542_v6, %v1538_v9 }
 0xfe3   :  { %v1543_v12 = vadd.f32 %v1542_v6, %v1537_v10 }
 0xfe5   :  { %3357 = vmatprep.mubr.msk.f32.mxu1 %vm214_vm0, %v1543_v12 }
 0xfe6   :  { %3358 = vmatmul.mubr.msk.f32.vlgmr.msra.gmra.mrb[16].mxu1 %vm214_vm0, %v1544_v11 }
0x10b9   :  { %v3359_v13 = vpop.f32.mrb[16].mxu1 }
0x10ba   :  { %v4369_v14 = vadd.f32 %v3359_v13, %v3030_v24  ;;  %v1623_v15 = vpop.f32.mrb[17].mxu1 }
0x10bb   :  { %v4371_v16 = vadd.f32 %v3030_v24, %v1623_v15 }
0x10bc   :  { %v1633_v32 = vmul.f32 %v4066_v43, %v4369_v14  ;;  %v1844_v39 = vmul.f32 %v4158_v31, %v4369_v14 }
0x10bd   :  { %v4375_v26 = vpack.i.bf16 %v4369_v14, %v4371_v16  ;;  %v1632_v17 = vmul.f32 %v4066_v43, %v4371_v16  ;;  %v1843_v35 = vmul.f32 %v4158_v31, %v4371_v16 }
0x10bf   :  { %3712 = vrot.lane.b32.xlu0 %v4375_v26, %s3818_s18  ;;  %3364 = vmatprep.mubr.msk.f32.mxu1 %vm214_vm0, %v1632_v17 }
0x1131   :  { %v3713_v21 = vpop.permute.xlu0 %3712 }
0x1132   :  { %v3715_v23 = vunpack.i.h.bf16 %v3713_v21  ;;  %v3714_v29 = vunpack.i.l.bf16 %v3713_v21 }
0x1134   :  { %v4382_v30 = vpack.c.bf16 %v3715_v23, %v3714_v29 }
0x1136   :  { %3605 = vmatprep.subr.msk.bf16.mxu1 %vm4087_vm6, %v4382_v30 }
0x1137   :  { %3608 = vmatpush3.bf16.xpose.msk.msra.mxu1 %vm4087_vm6, %v4382_v30 }
0x1138   :  { %3617 = vmatprep.subr.msk.bf16.mxu1 %vm4087_vm6, %v4382_v30 }
0x113e   :  { %3365 = vmatmul.mubr.msk.f32.vlgmr.msra.gmra.mrb[18].mxu1 %vm214_vm0, %v1633_v32 }
0x113f   :  { %3620 = vmatpush3.bf16.xpose.msk.msra.mxu1 %vm4087_vm6, %v4382_v30  ;;  %3378 = vmatprep.mubr.msk.f32.mxu1 %vm214_vm0, %v1843_v35 }
0x1146   :  { %3379 = vmatmul.mubr.msk.f32.vlgmr.msra.gmra.mrb[20].mxu1 %vm214_vm0, %v1844_v39 }
0x1211   :  { %v3366_v41 = vpop.f32.mrb[18].mxu1 }
0x1212   :  { %v1716_v25 = vpop.f32.mrb[19].mxu1  ;;  %v1726_v47 = vmul.f32 0.35355338, %v3366_v41 }
0x1213   :  { %v1725_v48 = vmul.f32 0.35355338, %v1716_v25 }
0x1214   :  { %v1728_v28 = vadd.f32 %v1726_v47, %v4123_v3 }
0x1215   :  { %v1727_v53 = vadd.f32 %v1725_v48, %v4121_v0 }
0x1216   :  { %v1732_v55 = vsel %vm447_vm5, %v1728_v28, -inf }
0x1217   :  { %v1729_v60 = vsel %vm443_vm4, %v1727_v53, -inf }
0x1218   :  { %1730 = vmax.xlane.f32.xlu1 %v1729_v60 }
0x1219   :  { %v3380_v49 = vpop.f32.mrb[20].mxu1 }
0x121a   :  { %v1917_v50 = vpop.f32.mrb[21].mxu1  ;;  %v1927_v45 = vmul.f32 0.35355338, %v3380_v49 }
0x121b   :  { %v1926_v54 = vmul.f32 0.35355338, %v1917_v50 }
0x121c   :  { %1733 = vmax.xlane.f32.xlu1 %v1732_v55  ;;  %v1929_v40 = vadd.f32 %v1927_v45, %v4123_v3  ;;  %v2037_v45 = vmul.f32 %v4069_v44, %v4371_v16 }
0x121d   :  { %v1928_v57 = vadd.f32 %v1926_v54, %v4121_v0  ;;  %v2038_v54 = vmul.f32 %v4069_v44, %v4369_v14 }
0x121e   :  { %v1933_v61 = vsel %vm447_vm5, %v1929_v40, -inf }
0x121f   :  { %v1930_v58 = vsel %vm443_vm4, %v1928_v57, -inf }
0x1220   :  { %1931 = vmax.xlane.f32.xlu1 %v1930_v58 }
0x1224   :  { %1934 = vmax.xlane.f32.xlu1 %v1933_v61 }
0x12a5   :  { %v1731_v63 = vpop.xlane.xlu1 %1730 }
0x12a6   :  { %v1735_v1 = vsub.f32 %v1727_v53, %v1731_v63 }
0x12a8   :  { %v1737_v4 = vmul.f32 1.442695, %v1735_v1 }
0x12a9   :  { %v1734_v2 = vpop.xlane.xlu1 %1733 }
0x12aa   :  { %v1736_v36 = vsub.f32 %v1728_v28, %v1734_v2 }
0x12ac   :  { %v1739_v62 = vmul.f32 1.442695, %v1736_v36 }
0x12ad   :  { %v1932_v59 = vpop.xlane.xlu1 %1931 }
0x12ae   :  { %3771 = vpow2.f32 %v1739_v62  ;;  %v1936_v56 = vsub.f32 %v1928_v57, %v1932_v59 }
0x12af   :  { %3773 = vpow2.f32 %v1737_v4 }
0x12b0   :  { %v1938_v38 = vmul.f32 1.442695, %v1936_v56 }
0x12b1   :  { %v1935_v6 = vpop.xlane.xlu1 %1934 }
0x12b2   :  { %3775 = vpow2.f32 %v1938_v38  ;;  %v1937_v7 = vsub.f32 %v1929_v40, %v1935_v6 }
0x12b4   :  { %v1940_v8 = vmul.f32 1.442695, %v1937_v7 }
0x12b6   :  { %3777 = vpow2.f32 %v1940_v8 }
0x12b8   :  { %v3772_v9 = vpop.eup %3771 }
0x12b9   :  { %v1744_v10 = vsel %vm447_vm5, %v3772_v9, 0.0  ;;  %v3774_v11 = vpop.eup %3773 }
0x12ba   :  { %1745 = vadd.xlane.f32.xlu1 %v1744_v10  ;;  %v1741_v24 = vsel %vm443_vm4, %v3774_v11, 0.0 }
0x12bc   :  { %v3776_v12 = vpop.eup %3775 }
0x12bd   :  { %v1942_v13 = vsel %vm443_vm4, %v3776_v12, 0.0 }
0x12be   :  { %1742 = vadd.xlane.f32.xlu1 %v1741_v24  ;;  %1943 = vadd.xlane.f32.xlu0 %v1942_v13 }
0x12c0   :  { %v3778_v15 = vpop.eup %3777 }
0x12c1   :  { %v1945_v17 = vsel %vm447_vm5, %v3778_v15, 0.0 }
0x12c2   :  { %1946 = vadd.xlane.f32.xlu1 %v1945_v17 }
0x12d3   :  { %3717 = vrot.lane.b32.xlu1 %v4375_v26, %s3820_s19 }
0x1347   :  { %v1746_v21 = vpop.xlane.xlu1 %1745 }
0x1348   :  { %3779 = vrcp.f32 %v1746_v21 }
0x134b   :  { %v1944_v23 = vpop.xlane.xlu0 %1943  ;;  %v1743_v29 = vpop.xlane.xlu1 %1742 }
0x134c   :  { %3781 = vrcp.f32 %v1743_v29 }
0x134d   :  { %3783 = vrcp.f32 %v1944_v23 }
0x134f   :  { %v1947_v32 = vpop.xlane.xlu1 %1946 }
0x1350   :  { %3785 = vrcp.f32 %v1947_v32 }
0x1352   :  { %v3780_v25 = vpop.eup %3779 }
0x1353   :  { %v3718_v35 = vpop.permute.xlu1 %3717  ;;  %v1750_v60 = vmul.f32 %v3780_v25, %v3772_v9  ;;  %v2231_v25 = vmul.f32 %v4209_v46, %v4371_v16 }
0x1354   :  { %v3720_v39 = vunpack.i.h.bf16 %v3718_v35  ;;  %v3719_v41 = vunpack.i.l.bf16 %v3718_v35 }
0x1356   :  { %v3609_v47 = vpack.c.bf16 %v3720_v39, %v3719_v41  ;;  %v3782_v48 = vpop.eup %3781 }
0x1357   :  { %v3784_v53 = vpop.eup %3783  ;;  %v1749_v26 = vmul.f32 %v3782_v48, %v3774_v11 }
0x1358   :  { %3611 = vmatprep.subr.msk.bf16.mxu0 %vm4136_vm11, %v3609_v47  ;;  %3635 = vmatprep.subr.msk.bf16.mxu1 %vm4136_vm11, %v3609_v47  ;;  %v1950_v49 = vmul.f32 %v3784_v53, %v3776_v12 }
0x1359   :  { %3614 = vmatpush3.bf16.msk.msra.mxu0 %vm4136_vm11, %v3609_v47  ;;  %3638 = vmatpush3.bf16.msk.msra.mxu1 %vm4136_vm11, %v3609_v47 }
0x135a   :  { %3371 = vmatprep.mubr.msk.f32.mxu0 %vm443_vm4, %v1749_v26  ;;  %3623 = vmatprep.subr.msk.bf16.mxu0 %vm4136_vm11, %v3609_v47  ;;  %v3786_v28 = vpop.eup %3785 }
0x135b   :  { %3641 = vmatprep.subr.msk.bf16.mxu1 %vm4087_vm6, %v4382_v30  ;;  %v1951_v50 = vmul.f32 %v3786_v28, %v3778_v15 }
0x135c   :  { %3372 = vmatmul.mubr.msk.f32.vlgmr.msra.gmra.mrb[12].mxu0 %vm443_vm4, %v1750_v60 }
0x135d   :  { %3626 = vmatpush3.bf16.msk.msra.mxu0 %vm4136_vm11, %v3609_v47  ;;  %3385 = vmatprep.mubr.msk.f32.mxu0 %vm443_vm4, %v1950_v49 }
0x135e   :  { %3629 = vmatprep.subr.msk.bf16.mxu0 %vm4087_vm6, %v4382_v30 }
0x1360   :  { %3386 = vmatmul.mubr.msk.f32.vlgmr.msra.gmra.mrb[14].mxu0 %vm443_vm4, %v1951_v50 }
0x1361   :  { %3392 = vmatprep.mubr.msk.f32.mxu0 %vm214_vm0, %v2037_v45 }
0x1366   :  { %3632 = vmatpush3.bf16.xpose.msk.msra.mxu0 %vm4087_vm6, %v4382_v30 }
0x1367   :  { %3647 = vmatprep.subr.msk.bf16.mxu0 %vm4136_vm11, %v3609_v47 }
0x136d   :  { %3393 = vmatmul.mubr.msk.f32.vlgmr.msra.gmra.mrb[16].mxu0 %vm214_vm0, %v2038_v54 }
0x136e   :  { %3650 = vmatpush3.bf16.msk.msra.mxu0 %vm4136_vm11, %v3609_v47  ;;  %v2232_v47 = vmul.f32 %v4209_v46, %v4369_v14 }
0x142f   :  { %v3373_v55 = vpop.f32.mrb[12].mxu0 }
0x1430   :  { %v1830_v57 = vpop.f32.mrb[13].mxu0  ;;  %v1840_v40 = vmul.f32 %v3373_v55, %v4066_v43 }
0x1431   :  { %v1839_v1 = vmul.f32 %v4066_v43, %v1830_v57 }
0x1433   :  { %v3387_v58 = vpop.f32.mrb[14].mxu0 }
0x1434   :  { %v2034_v61 = vmul.f32 %v3387_v58, %v4158_v31  ;;  %v2024_v63 = vpop.f32.mrb[15].mxu0 }
0x1435   :  { %v2033_v2 = vmul.f32 %v4158_v31, %v2024_v63 }
0x1436   :  { %v2036_v36 = vadd.f32 %v2034_v61, %v1840_v40 }
0x1437   :  { %v2035_v4 = vadd.f32 %v2033_v2, %v1839_v1 }
0x1440   :  { %v3394_v62 = vpop.f32.mrb[16].mxu0 }
0x1441   :  { %v2121_v59 = vmul.f32 0.35355338, %v3394_v62  ;;  %v2111_v56 = vpop.f32.mrb[17].mxu0 }
0x1442   :  { %v2120_v38 = vmul.f32 0.35355338, %v2111_v56 }
0x1443   :  { %v2123_v6 = vadd.f32 %v2121_v59, %v4123_v3 }
0x1444   :  { %v2122_v7 = vadd.f32 %v2120_v38, %v4121_v0 }
0x1445   :  { %v2127_v8 = vsel %vm447_vm5, %v2123_v6, -inf }
0x1446   :  { %2128 = vmax.xlane.f32.xlu0 %v2127_v8  ;;  %v2124_v9 = vsel %vm443_vm4, %v2122_v7, -inf }
0x1447   :  { %2125 = vmax.xlane.f32.xlu1 %v2124_v9  ;;  %v3014_v9 = vld [vmem:[%s4628_s6 + $0x30] sm:$0xff] }
0x14d3   :  { %v2129_v10 = vpop.xlane.xlu0 %2128 }
0x14d4   :  { %v2131_v43 = vsub.f32 %v2123_v6, %v2129_v10  ;;  %v2126_v11 = vpop.xlane.xlu1 %2125  ;;  %v3015_v10 = vld [vmem:[%s4628_s6 + $0x38] sm:$0xff] }
0x14d5   :  { %v2130_v31 = vsub.f32 %v2122_v7, %v2126_v11 }
0x14d6   :  { %v2134_v12 = vmul.f32 1.442695, %v2131_v43  ;;  %v3655_v43 = vpack.c.bf16 %v3015_v10, %v3014_v9  ;;  %v3028_v10 = vld [vmem:[%s4630_s10 + $0x70] sm:$0xff] }
0x14d7   :  { %v2132_v24 = vmul.f32 1.442695, %v2130_v31 }
0x14d9   :  { %3787 = vpow2.f32 %v2132_v24 }
0x14da   :  { %3789 = vpow2.f32 %v2134_v12 }
0x14e3   :  { %v3788_v13 = vpop.eup %3787 }
0x14e4   :  { %v2136_v15 = vsel %vm443_vm4, %v3788_v13, 0.0  ;;  %v3790_v17 = vpop.eup %3789 }
0x14e5   :  { %2137 = vadd.xlane.f32.xlu0 %v2136_v15  ;;  %v2139_v21 = vsel %vm447_vm5, %v3790_v17, 0.0 }
0x14e9   :  { %2140 = vadd.xlane.f32.xlu0 %v2139_v21 }
0x1572   :  { %v2138_v23 = vpop.xlane.xlu0 %2137 }
0x1573   :  { %3791 = vrcp.f32 %v2138_v23 }
0x1576   :  { %v2141_v29 = vpop.xlane.xlu0 %2140 }
0x1577   :  { %3793 = vrcp.f32 %v2141_v29 }
0x157d   :  { %v3792_v32 = vpop.eup %3791 }
0x157e   :  { %v2144_v35 = vmul.f32 %v3792_v32, %v3788_v13 }
0x1580   :  { %3399 = vmatprep.mubr.msk.f32.mxu1 %vm443_vm4, %v2144_v35 }
0x1581   :  { %v3794_v39 = vpop.eup %3793 }
0x1582   :  { %v2145_v41 = vmul.f32 %v3794_v39, %v3790_v17  ;;  %v2428_v17 = vrot.slane %v4356_v5, %v1159_v51 }
0x1584   :  { %3400 = vmatmul.mubr.msk.f32.vlgmr.msra.gmra.mrb[22].mxu1 %vm443_vm4, %v2145_v41 }
0x1585   :  { %3644 = vmatpush3.bf16.xpose.msk.msra.mxu1 %vm4087_vm6, %v4382_v30  ;;  %3406 = vmatprep.mubr.msk.f32.mxu1 %vm214_vm0, %v2231_v25  ;;  %vm3823_vm6 = vmmov 0  }
0x158c   :  { %3407 = vmatmul.mubr.msk.f32.vlgmr.msra.gmra.mrb[24].mxu1 %vm214_vm0, %v2232_v47 }
0x1657   :  { %v3401_v48 = vpop.f32.mrb[22].mxu1 }
0x1658   :  { %v2228_v53 = vmul.f32 %v3401_v48, %v4069_v44  ;;  %v2218_v26 = vpop.f32.mrb[23].mxu1 }
0x1659   :  { %v2227_v60 = vmul.f32 %v4069_v44, %v2218_v26 }
0x165a   :  { %v2230_v16 = vadd.f32 %v2228_v53, %v2036_v36 }
0x165b   :  { %v2229_v28 = vadd.f32 %v2227_v60, %v2035_v4  ;;  %v3013_v4 = vld [vmem:[%s4628_s6 + $0x28] sm:$0xff] }
0x165f   :  { %v3408_v49 = vpop.f32.mrb[24].mxu1 }
0x1660   :  { %v2305_v50 = vpop.f32.mrb[25].mxu1  ;;  %v2315_v45 = vmul.f32 0.35355338, %v3408_v49  ;;  %v3018_v49 = vld [vmem:[%s4629_s8 + $0x28] sm:$0xff] }
0x1661   :  { %v2314_v52 = vmul.f32 0.35355338, %v2305_v50 }
0x1662   :  { %v2317_v14 = vadd.f32 %v2315_v45, %v4123_v3  ;;  %v3012_v3 = vld [vmem:[%s4628_s6 + $0x20] sm:$0xff]  ;;  %v3019_v45 = vld [vmem:[%s4629_s8 + $0x30] sm:$0xff] }
0x1663   :  { %v2316_v30 = vadd.f32 %v2314_v52, %v4121_v0  ;;  %v3651_v62 = vpack.c.bf16 %v3013_v4, %v3012_v3  ;;  %v3020_v52 = vld [vmem:[%s4629_s8 + $0x38] sm:$0xff] }
0x1664   :  { %v2321_v55 = vsel %vm447_vm5, %v2317_v14, -inf }
0x1665   :  { %v2318_v54 = vsel %vm443_vm4, %v2316_v30, -inf  ;;  %3652 = vmatprep.subr.bf16.mxu0 %v3651_v62 }
0x1666   :  { %2319 = vmax.xlane.f32.xlu0 %v2318_v54 }
0x166a   :  { %2322 = vmax.xlane.f32.xlu0 %v2321_v55 }
0x16f3   :  { %v2320_v57 = vpop.xlane.xlu0 %2319 }
0x16f4   :  { %v2324_v58 = vsub.f32 %v2316_v30, %v2320_v57  ;;  %v3663_v30 = vpack.c.bf16 %v3020_v52, %v3019_v45 }
0x16f6   :  { %v2326_v40 = vmul.f32 1.442695, %v2324_v58 }
0x16f7   :  { %v2323_v44 = vpop.xlane.xlu0 %2322 }
0x16f8   :  { %3795 = vpow2.f32 %v2326_v40  ;;  %v2325_v61 = vsub.f32 %v2317_v14, %v2323_v44  ;;  %v2541_v44 = vrot.slane %v4356_v5, %v1272_v18  ;;  %v3022_v18 = vld [vmem:[%s4630_s10 + $0x40] sm:$0xff] }
0x16fa   :  { %v2328_v63 = vmul.f32 1.442695, %v2325_v61 }
0x16fc   :  { %3797 = vpow2.f32 %v2328_v63 }
0x1702   :  { %v3796_v1 = vpop.eup %3795 }
0x1703   :  { %v2330_v2 = vsel %vm443_vm4, %v3796_v1, 0.0 }
0x1704   :  { %2331 = vadd.xlane.f32.xlu0 %v2330_v2 }
0x1706   :  { %v3798_v0 = vpop.eup %3797 }
0x1707   :  { %v2333_v36 = vsel %vm447_vm5, %v3798_v0, 0.0 }
0x1708   :  { %2334 = vadd.xlane.f32.xlu0 %v2333_v36 }
0x1791   :  { %v2332_v59 = vpop.xlane.xlu0 %2331 }
0x1792   :  { %3799 = vrcp.f32 %v2332_v59  ;;  %v3023_v59 = vld [vmem:[%s4630_s10 + $0x48] sm:$0xff] }
0x1795   :  { %v2335_v56 = vpop.xlane.xlu0 %2334 }
0x1796   :  { %3801 = vrcp.f32 %v2335_v56  ;;  %v3667_v56 = vpack.c.bf16 %v3023_v59, %v3022_v18 }
0x179c   :  { %v3800_v38 = vpop.eup %3799 }
0x179d   :  { %v2338_v6 = vmul.f32 %v3800_v38, %v3796_v1  ;;  %v3025_v38 = vld [vmem:[%s4630_s10 + $0x58] sm:$0xff] }
0x179f   :  { %3413 = vmatprep.mubr.msk.f32.mxu0 %vm443_vm4, %v2338_v6  ;;  %v3026_v6 = vld [vmem:[%s4630_s10 + $0x60] sm:$0xff] }
0x17a0   :  { %v3802_v7 = vpop.eup %3801 }
0x17a1   :  { %v2339_v8 = vmul.f32 %v3802_v7, %v3798_v0  ;;  %v2547_v0 = vrot.slane %v4356_v5, %v1278_v19  ;;  %v3024_v19 = vld [vmem:[%s4630_s10 + $0x50] sm:$0xff] }
0x17a2   :  { %v3671_v7 = vpack.c.bf16 %v3025_v38, %v3024_v19  ;;  %v3071_v19 = vld [vmem:[%s4634_s11] ss:$0 sm:$0xff] }
0x17a3   :  { %3414 = vmatmul.mubr.msk.f32.vlgmr.msra.gmra.mrb[18].mxu0 %vm443_vm4, %v2339_v8  ;;  %v3027_v8 = vld [vmem:[%s4630_s10 + $0x68] sm:$0xff] }
0x17a4   :  { %3654 = vmatpush3.bf16.msra.mxu0 %v3651_v62  ;;  %v3675_v9 = vpack.c.bf16 %v3027_v8, %v3026_v6  ;;  %v3072_v6 = vld [vmem:[%s4634_s11 + $0x1] ss:$0 sm:$0xff] }
0x17a5   :  { %3656 = vmatprep.subr.bf16.mxu0 %v3655_v43 }
0x17a8   :  { %3658 = vmatpush3.bf16.msra.mxu0 %v3655_v43  ;;  %v3029_v43 = vld [vmem:[%s4630_s10 + $0x78] sm:$0xff] }
0x17a9   :  { %3668 = vmatprep.subr.bf16.mxu0 %v3667_v56 }
0x1876   :  { %v3415_v11 = vpop.f32.mrb[18].mxu0 }
0x1877   :  { %v2422_v31 = vmul.f32 %v3415_v11, %v4209_v46  ;;  %v2412_v12 = vpop.f32.mrb[19].mxu0  ;;  %v3679_v11 = vpack.c.bf16 %v3029_v43, %v3028_v10 }
0x1878   :  { %v2421_v24 = vmul.f32 %v4209_v46, %v2412_v12 }
0x1879   :  { %v2424_v13 = vadd.f32 %v2422_v31, %v2230_v16  ;;  %v3063_v31 = vld [vmem:[%s4631_s9 + $0x1] ss:$0 sm:$0xff] }
0x187a   :  { %v2423_v15 = vadd.f32 %v2421_v24, %v2229_v28  ;;  %v3017_v28 = vld [vmem:[%s4629_s8 + $0x20] sm:$0xff] }
0x187b   :  { %v3659_v50 = vpack.c.bf16 %v3018_v49, %v3017_v28  ;;  %v3822_v49 = vmov 0.0|0.0  }
0x187c   :  { %3424 = vmatprep.mubr.msk.f32.mxu0 %vm214_vm0, %v2423_v15 }
0x187d   :  { %3425 = vmatmul.mubr.msk.f32.vlgmr.msra.gmra.mrb[20].mxu0 %vm214_vm0, %v2424_v13  ;;  %3660 = vmatprep.subr.bf16.mxu1 %v3659_v50 }
0x187e   :  { %3662 = vmatpush3.bf16.msra.mxu1 %v3659_v50  ;;  %3670 = vmatpush3.bf16.msra.mxu0 %v3667_v56  ;;  %v2741_v50 = vrot.slane %v4356_v5, %v1473_v20 }
0x187f   :  { %3664 = vmatprep.subr.bf16.mxu1 %v3663_v30  ;;  %3672 = vmatprep.subr.bf16.mxu0 %v3671_v7 }
0x1882   :  { %3666 = vmatpush3.bf16.msra.mxu1 %v3663_v30  ;;  %3674 = vmatpush3.bf16.msra.mxu0 %v3671_v7 }
0x1883   :  { %3676 = vmatprep.subr.bf16.mxu0 %v3675_v9  ;;  %3683 = vmatprep.subr.bf16.mxu1 %v3822_v49 }
0x1886   :  { %3678 = vmatpush3.bf16.msra.mxu0 %v3675_v9  ;;  %v3073_v9 = vld [vmem:[%s4635_s13] ss:$0 sm:$0xff] }
0x1887   :  { %3680 = vmatprep.subr.bf16.mxu0 %v3679_v11 }
0x188a   :  { %3682 = vmatpush3.bf16.msra.mxu0 %v3679_v11 }
0x1950   :  { %v3426_v21 = vpop.f32.mrb[20].mxu0 }
0x1951   :  { %v2507_v23 = vadd.f32 %v3426_v21, %v2428_v17  ;;  %v2501_v29 = vpop.f32.mrb[21].mxu0 }
0x1952   :  { %v2502_v32 = vadd.f32 %v2501_v29, %v2428_v17 }
0x1953   :  { %v4505_v35 = vadd.f32 %v2507_v23, %v4329_v33 }
0x1954   :  { %v4508_v39 = vadd.f32 %v2502_v32, %v4331_v34 }
0x1955   :  { %v2515_v46 = vsel %vm218_vm1, %v4505_v35, 0.0 }
0x1956   :  { %2516 = vadd.xlane.f32.xlu1 %v2515_v46  ;;  %v2512_v41 = vsel %vm214_vm0, %v4508_v39, 0.0 }
0x1957   :  { %2513 = vadd.xlane.f32.xlu0 %v2512_v41 }
0x19e3   :  { %v2517_v25 = vpop.xlane.xlu1 %2516 }
0x19e4   :  { %v2519_v51 = vmul.f32 0.03125, %v2517_v25  ;;  %v2514_v47 = vpop.xlane.xlu0 %2513 }
0x19e5   :  { %v2518_v48 = vmul.f32 0.03125, %v2514_v47 }
0x19e6   :  { %v2521_v53 = vsub.f32 %v4505_v35, %v2519_v51 }
0x19e7   :  { %v2520_v33 = vsub.f32 %v4508_v39, %v2518_v48 }
0x19e8   :  { %v2523_v26 = vmul.f32 %v2521_v53, %v2521_v53 }
0x19e9   :  { %v2522_v60 = vmul.f32 %v2520_v33, %v2520_v33 }
0x19ea   :  { %v2527_v34 = vsel %vm218_vm1, %v2523_v26, 0.0 }
0x19eb   :  { %2528 = vadd.xlane.f32.xlu1 %v2527_v34  ;;  %v2524_v16 = vsel %vm214_vm0, %v2522_v60, 0.0 }
0x19ec   :  { %2525 = vadd.xlane.f32.xlu0 %v2524_v16 }
0x1a78   :  { %v2529_v54 = vpop.xlane.xlu1 %2528 }
0x1a79   :  { %v2531_v14 = vmul.f32 0.03125, %v2529_v54  ;;  %v2526_v55 = vpop.xlane.xlu0 %2525  ;;  %v2744_v54 = vmul.u32 5, %v4038_v22 }
0x1a7a   :  { %v2530_v57 = vmul.f32 0.03125, %v2526_v55 }
0x1a7b   :  { %v2533_v58 = vadd.f32 1e-12, %v2531_v14  ;;  %vm2745_vm3 = vcmp.eq.s32.totalorder %v4055_v37, %v2744_v54 }
0x1a7c   :  { %v2532_v40 = vadd.f32 1e-12, %v2530_v57 }
0x1a7d   :  { %3803 = vrsqrt.f32 %v2533_v58 }
0x1a7e   :  { %3805 = vrsqrt.f32 %v2532_v40  ;;  %v3068_v40 = vsel %vm2745_vm3, 1.0, %v3817_v42 }
0x1a87   :  { %v3804_v61 = vpop.eup %3803 }
0x1a88   :  { %v3806_v63 = vpop.eup %3805  ;;  %v2537_v1 = vmul.f32 %v3804_v61, %v2521_v53 }
0x1a89   :  { %v2536_v2 = vmul.f32 %v3806_v63, %v2520_v33  ;;  %v2849_v63 = vld [vmem:[%s4632_s12] sm:$0xff] }
0x1a8a   :  { %v2543_v36 = vmul.f32 %v2541_v44, %v2537_v1 }
0x1a8b   :  { %v2542_v3 = vmul.f32 %v2541_v44, %v2536_v2  ;;  %v2851_v2 = vld [vmem:[%s4632_s12 + $0x10] sm:$0xff] }
0x1a8c   :  { %v2549_v62 = vadd.f32 %v2547_v0, %v2543_v36 }
0x1a8d   :  { %v2548_v4 = vadd.f32 %v2547_v0, %v2542_v3  ;;  %v2852_v0 = vld [vmem:[%s4632_s12 + $0x18] sm:$0xff]  ;;  %v3824_v3 = vmov 0  }
0x1a8e   :  { %v3691_v36 = vpack.c.bf16 %v2852_v0, %v2851_v2  ;;  %3721 = vset.pattern.permute.xlu1 %v3824_v3  ;;  %3722 = vset.pattern.permute.xlu0 %v3824_v3 }
0x1a8f   :  { %3435 = vmatprep.mubr.msk.f32.mxu1 %vm214_vm0, %v2548_v4  ;;  %v2947_v4 = vld [vmem:[%s4633_s3] sm:$0x3] }
0x1a90   :  { %3436 = vmatmul.mubr.msk.f32.vlgmr.msra.gmra.mrb[26].mxu1 %vm214_vm0, %v2549_v62 }
0x1a91   :  { %3461 = vmatprep.mubr.msk.f32.mxu1 %vm3823_vm6, %v3817_v42 }
0x1b63   :  { %v3437_v12 = vpop.f32.mrb[26].mxu1 }
0x1b64   :  { %v2634_v24 = vadd.f32 %v3437_v12, %v3063_v31  ;;  %v2628_v13 = vpop.f32.mrb[27].mxu1 }
0x1b65   :  { %v2629_v15 = vadd.f32 %v3063_v31, %v2628_v13 }
0x1b66   :  { %v2640_v17 = vmul.f32 0.044715, %v2634_v24  ;;  %v2638_v34 = vmul.f32 0.5, %v2634_v24 }
0x1b67   :  { %v2639_v21 = vmul.f32 0.044715, %v2629_v15  ;;  %v2637_v26 = vmul.f32 0.5, %v2629_v15 }
0x1b68   :  { %v2642_v23 = vmul.f32 %v2640_v17, %v2634_v24 }
0x1b69   :  { %v2641_v29 = vmul.f32 %v2639_v21, %v2629_v15 }
0x1b6a   :  { %v2644_v32 = vmul.f32 %v2642_v23, %v2634_v24 }
0x1b6b   :  { %v2643_v46 = vmul.f32 %v2641_v29, %v2629_v15 }
0x1b6c   :  { %v2646_v41 = vadd.f32 %v2644_v32, %v2634_v24 }
0x1b6d   :  { %v2645_v25 = vadd.f32 %v2643_v46, %v2629_v15 }
0x1b6e   :  { %v2648_v51 = vmul.f32 0.7978846, %v2646_v41 }
0x1b6f   :  { %v2647_v47 = vmul.f32 0.7978846, %v2645_v25 }
0x1b70   :  { %3807 = vtanh.f32 %v2648_v51 }
0x1b71   :  { %3809 = vtanh.f32 %v2647_v47 }
0x1b7a   :  { %v3808_v48 = vpop.eup %3807 }
0x1b7b   :  { %v3810_v53 = vpop.eup %3809  ;;  %v2652_v33 = vadd.f32 1.0, %v3808_v48 }
0x1b7c   :  { %v2651_v60 = vadd.f32 1.0, %v3810_v53 }
0x1b7d   :  { %v2654_v28 = vmul.f32 %v2652_v33, %v2638_v34 }
0x1b7e   :  { %v2653_v16 = vmul.f32 %v2651_v60, %v2637_v26 }
0x1b80   :  { %3454 = vmatprep.mubr.msk.f32.mxu0 %vm1387_vm2, %v2653_v16 }
0x1b81   :  { %3455 = vmatmul.mubr.msk.f32.vlgmr.msra.gmra.mrb[22].mxu0 %vm1387_vm2, %v2654_v28 }
0x1c54   :  { %v3456_v45 = vpop.f32.mrb[22].mxu0 }
0x1c55   :  { %v2737_v52 = vadd.f32 %v3456_v45, %v4505_v35  ;;  %v2727_v30 = vpop.f32.mrb[23].mxu0 }
0x1c56   :  { %v2736_v14 = vadd.f32 %v2727_v30, %v4508_v39 }
0x1c57   :  { %v2743_v55 = vadd.f32 %v2741_v50, %v2737_v52 }
0x1c58   :  { %v2742_v57 = vadd.f32 %v2741_v50, %v2736_v14 }
0x1c5a   :  { %v3684_v58 = vpack.c.bf16 %v2743_v55, %v2742_v57 }
0x1c5c   :  { %3686 = vmatpush3.bf16.msk.msra.mxu1 %vm4136_vm11, %v3684_v58 }
0x1c5d   :  { %3687 = vmatprep.subr.bf16.mxu1 %v3822_v49 }
0x1c5f   :  { %3462 = vmatmul.mubr.msk.f32.vlgmr.msra.gmra.mrb[28].mxu1 %vm443_vm4, %v3068_v40  ;;  %vm2957_vm4 = vcmp.eq.s32.totalorder %v4055_v37, 2 }
0x1c60   :  { %3472 = vmatprep.mubr.msk.f32.mxu1 %vm3823_vm6, %v3817_v42  ;;  %v2850_v42 = vld [vmem:[%s4632_s12 + $0x8] sm:$0xff] }
0x1c61   :  { %v3688_v1 = vpack.c.bf16 %v2850_v42, %v2849_v63 }
0x1c63   :  { %3689 = vmatpush3.bf16.msra.mxu1 %v3688_v1 }
0x1c64   :  { %3690 = vmatprep.subr.bf16.mxu1 %v3822_v49 }
0x1c67   :  { %3692 = vmatpush3.bf16.msra.mxu1 %v3691_v36 }
0x1d32   :  { %v2820_v20 = vpop.f32.mrb[28].mxu1 }
0x1d33   :  { %v3463_v22 = vpop.f32.mrb[29].mxu1  ;;  %v2826_v5 = vsel %vm218_vm1, %v2820_v20, 0.0 }
0x1d34   :  { %2827 = vadd.xlane.f32.xlu0 %v2826_v5 }
0x1dc1   :  { %v2828_v35 = vpop.xlane.xlu0 %2827 }
0x1dc2   :  { %v2829_v39 = vmul.f32 0.03125, %v2828_v35 }
0x1dc4   :  { %v2830_v44 = vsub.f32 %v2820_v20, %v2829_v39 }
0x1dc6   :  { %v2831_v61 = vmul.f32 %v2830_v44, %v2830_v44 }
0x1dc8   :  { %v2832_v27 = vsel %vm218_vm1, %v2831_v61, 0.0  ;;  %vm2933_vm1 = vcmp.lt.s32.totalorder %v4055_v37, 2 }
0x1dc9   :  { %2833 = vadd.xlane.f32.xlu1 %v2832_v27 }
0x1dda   :  { %2949 = vperm.xlu1 %3721, %v2947_v4  }
0x1e56   :  { %v2834_v62 = vpop.xlane.xlu1 %2833 }
0x1e57   :  { %v2835_v18 = vmul.f32 0.03125, %v2834_v62 }
0x1e59   :  { %v2836_v59 = vadd.f32 1e-12, %v2835_v18 }
0x1e5a   :  { %v2950_v17 = vpop.permute.xlu1 %2949 }
0x1e5b   :  { %3811 = vrsqrt.f32 %v2836_v59 }
0x1e65   :  { %v3812_v56 = vpop.eup %3811 }
0x1e66   :  { %v2838_v38 = vmul.f32 %v3812_v56, %v2830_v44 }
0x1e68   :  { %v2843_v7 = vmul.f32 %v3071_v19, %v2838_v38 }
0x1e6a   :  { %v2848_v8 = vadd.f32 %v3072_v6, %v2843_v7 }
0x1e6c   :  { %3473 = vmatmul.mubr.msk.f32.vlgmr.msra.gmra.mrb[30].mxu1 %vm214_vm0, %v2848_v8  ;;  %vm2951_vm0 = vcmp.eq.s32.totalorder %v4055_v37, %v2950_v17 }
0x1f3f   :  { %v2929_v10 = vpop.f32.mrb[30].mxu1 }
0x1f40   :  { %v2930_v43 = vadd.f32 %v3073_v9, %v2929_v10  ;;  %v3474_v11 = vpop.f32.mrb[31].mxu1 }
0x1f42   :  { %v2934_v31 = vsel %vm2933_vm1, %v2930_v43, -1e+30  ;;  %v2952_v29 = vsel %vm2951_vm0, %v2930_v43, 0.0 }
0x1f43   :  { %v2935_v12 = vsel %vm478_vm7, %v2934_v31, -inf  ;;  %v2953_v32 = vsel %vm478_vm7, %v2952_v29, 0.0 }
0x1f44   :  { %2936 = vmax.xlane.f32.xlu0 %v2935_v12 }
0x1fd1   :  { %v2937_v24 = vpop.xlane.xlu0 %2936 }
0x1fd2   :  { %v2938_v13 = vsub.f32 %v2934_v31, %v2937_v24 }
0x1fd4   :  { %v2939_v15 = vmul.f32 1.442695, %v2938_v13 }
0x1fd6   :  { %3813 = vpow2.f32 %v2939_v15 }
0x1fe0   :  { %v3814_v21 = vpop.eup %3813 }
0x1fe1   :  { %v2941_v23 = vsel %vm478_vm7, %v3814_v21, 0.0 }
0x1fe2   :  { %2942 = vadd.xlane.f32.xlu0 %v2941_v23 }
0x1fe6   :  { %2954 = vadd.xlane.f32.xlu0 %v2953_v32 }
0x206f   :  { %v2943_v46 = vpop.xlane.xlu0 %2942 }
0x2070   :  { %3815 = vlog2.f32 %v2943_v46 }
0x2073   :  { %v2955_v47 = vpop.xlane.xlu0 %2954 }
0x207a   :  { %v3816_v41 = vpop.eup %3815 }
0x207b   :  { %v2945_v25 = vmul.f32 0.6931472, %v3816_v41 }
0x207d   :  { %v2946_v51 = vadd.f32 %v2945_v25, %v2937_v24 }
0x207f   :  { %v2956_v48 = vsub.f32 %v2946_v51, %v2955_v47 }
0x2081   :  { %v2958_v53 = vsel %vm2957_vm4, %v2956_v48, 0.0 }
0x2082   :  { %v2959_v33 = vsel %vm2933_vm1, %v2930_v43, %v2958_v53 }
0x2083   :  { %2960 = vst [vmem:[%s4636_s14] sm:$0x3] %v2959_v33 }

</bundles_post_ra>
